<compile_context>
chip_gen: v7x
topology: tpu7x:2x2x1
jax: 0.10.0
libtpu: 0.0.40
codegen_flags: <defaults>
</compile_context>

<pallas_src>
import math
from functools import partial

import jax
import jax.numpy as jnp
from jax.experimental import pallas as pl
from jax.experimental.pallas import tpu as pltpu


# ------------------------------ kernel helpers ------------------------------

def _layernorm(x, g, b, eps):
    mu = jnp.mean(x, axis=-1, keepdims=True)
    var = jnp.mean(jnp.square(x - mu), axis=-1, keepdims=True)
    return (x - mu) * jax.lax.rsqrt(var + eps) * g + b


def _gelu(x):
    # Exact (erf) GELU, matching BERT's default activation.
    return 0.5 * x * (1.0 + jax.lax.erf(x * (1.0 / math.sqrt(2.0))))


# ------------------------- fused BERT encoder kernel -------------------------

def _bert_encoder_kernel(emb_ref, eg_ref, eb_ref,
                         wqkv_ref, bqkv_ref, wo_ref, bo_ref,
                         ln1g_ref, ln1b_ref,
                         wi_ref, bi_ref, wf_ref, bf_ref,
                         ln2g_ref, ln2b_ref,
                         o_ref, h_sc, ctx_sc,
                         *, B, S, nH, dh, eps):
    """One grid step == one encoder layer.  h_sc carries the activation."""
    H = nH * dh

    # Layer 0: embedding LayerNorm (LN-only path, no zero-residual add).
    @pl.when(pl.program_id(0) == 0)
    def _():
        h_sc[...] = _layernorm(emb_ref[...], eg_ref[...], eb_ref[...], eps)

    h = h_sc[...]                                              # (B*S, H) f32

    # ---- fused Q|K|V projection: one MXU pass, lane-wide (3H) output ----
    qkv = (jnp.dot(h, wqkv_ref[0], preferred_element_type=jnp.float32)
           + bqkv_ref[0])                                      # (B*S, 3H)
    q = qkv[:, 0:H]
    k = qkv[:, H:2 * H]
    v = qkv[:, 2 * H:3 * H]

    # ---- scaled-dot-product attention, all data VMEM/vreg resident ----
    # Heads are contiguous lane slices (no transposes); static unroll over
    # (batch, head) — everything stays inside this single kernel.
    scale = 1.0 / math.sqrt(dh)
    for b in range(B):
        r0 = b * S
        for hh in range(nH):
            c0 = hh * dh
            qh = q[r0:r0 + S, c0:c0 + dh]                      # (S, dh)
            kh = k[r0:r0 + S, c0:c0 + dh]
            vh = v[r0:r0 + S, c0:c0 + dh]
            s = jnp.dot(qh, kh.T, preferred_element_type=jnp.float32) * scale
            s = s - jnp.max(s, axis=-1, keepdims=True)
            p = jnp.exp(s)
            p = p * pl.reciprocal(jnp.sum(p, axis=-1, keepdims=True),
                                  approx=True)
            ctx_sc[r0:r0 + S, c0:c0 + dh] = jnp.dot(
                p, vh, preferred_element_type=jnp.float32)

    # ---- output projection + residual + LayerNorm (fused epilogue) ----
    attn_out = (jnp.dot(ctx_sc[...], wo_ref[0],
                        preferred_element_type=jnp.float32) + bo_ref[0])
    h1 = _layernorm(attn_out + h, ln1g_ref[0], ln1b_ref[0], eps)

    # ---- FFN: GELU(h1 @ wi + bi) @ wf + bf, residual + LayerNorm ----
    inter = (jnp.dot(h1, wi_ref[0], preferred_element_type=jnp.float32)
             + bi_ref[0])
    inter = _gelu(inter)
    ff = (jnp.dot(inter, wf_ref[0], preferred_element_type=jnp.float32)
          + bf_ref[0])
    h2 = _layernorm(ff + h1, ln2g_ref[0], ln2b_ref[0], eps)

    h_sc[...] = h2                       # carry to next layer
    o_ref[...] = h2.astype(o_ref.dtype)  # output stays resident; written once


# ----------------------------- model parameters -----------------------------

CFG = dict(vocab=100, hidden=32, layers=2, heads=4, intermediate=64,
           max_pos=16, type_vocab=2)


def init_params(key, cfg):
    H, I, L = cfg["hidden"], cfg["intermediate"], cfg["layers"]
    ks = iter(jax.random.split(key, 128))
    n = lambda shape, s=0.02: (s * jax.random.normal(next(ks), shape)
                               ).astype(jnp.float32)

    def layer():
        wq, wk, wv = n((H, H)), n((H, H)), n((H, H))
        return {
            "wqkv": jnp.concatenate([wq, wk, wv], axis=1),        # (H, 3H)
            "bqkv": jnp.zeros((1, 3 * H), jnp.float32),
            "wo": n((H, H)), "bo": jnp.zeros((1, H), jnp.float32),
            "ln1_g": jnp.ones((1, H), jnp.float32),
            "ln1_b": jnp.zeros((1, H), jnp.float32),
            "wi": n((H, I)), "bi": jnp.zeros((1, I), jnp.float32),
            "wf": n((I, H)), "bf": jnp.zeros((1, H), jnp.float32),
            "ln2_g": jnp.ones((1, H), jnp.float32),
            "ln2_b": jnp.zeros((1, H), jnp.float32),
        }

    layers = [layer() for _ in range(L)]
    stacked = {k: jnp.stack([ly[k] for ly in layers], axis=0)
               for k in layers[0]}                                # (L, ...)

    return {
        "word_emb": n((cfg["vocab"], H)),
        "pos_emb": n((cfg["max_pos"], H)),
        "type_emb": n((cfg["type_vocab"], H)),
        "emb_ln_g": jnp.ones((1, H), jnp.float32),
        "emb_ln_b": jnp.zeros((1, H), jnp.float32),
        **stacked,
    }


# --------------------------------- forward ----------------------------------

def bert_forward(x_ids, params, cfg):
    """Equivalent of Bert.forward: returns last hidden states (embeds)."""
    B, S = x_ids.shape
    H, I, L, nH = (cfg["hidden"], cfg["intermediate"],
                   cfg["layers"], cfg["heads"])
    dh = H // nH
    M = B * S

    # Embedding gather (plain-JAX glue): word + position + token-type(0).
    word = params["word_emb"][x_ids]                      # [B,S,H]
    pos = params["pos_emb"][:S][None, :, :]               # [1,S,H]
    tok = params["type_emb"][0][None, None, :]            # [1,1,H]
    emb = (word + pos + tok).reshape(M, H).astype(jnp.float32)

    layer_spec = lambda shape: pl.BlockSpec(shape, lambda l: (l, 0, 0))
    const_spec = lambda shape: pl.BlockSpec(
        shape, lambda l, _n=len(shape): (0,) * _n)

    out = pl.pallas_call(
        partial(_bert_encoder_kernel, B=B, S=S, nH=nH, dh=dh, eps=1e-12),
        out_shape=jax.ShapeDtypeStruct((M, H), jnp.float32),
        grid=(L,),
        in_specs=[
            const_spec((M, H)),            # embeddings
            const_spec((1, H)),            # emb_ln_g
            const_spec((1, H)),            # emb_ln_b
            layer_spec((1, H, 3 * H)),     # wqkv
            layer_spec((1, 1, 3 * H)),     # bqkv
            layer_spec((1, H, H)),         # wo
            layer_spec((1, 1, H)),         # bo
            layer_spec((1, 1, H)),         # ln1_g
            layer_spec((1, 1, H)),         # ln1_b
            layer_spec((1, H, I)),         # wi
            layer_spec((1, 1, I)),         # bi
            layer_spec((1, I, H)),         # wf
            layer_spec((1, 1, H)),         # bf
            layer_spec((1, 1, H)),         # ln2_g
            layer_spec((1, 1, H)),         # ln2_b
        ],
        out_specs=pl.BlockSpec((M, H), lambda l: (0, 0)),
        scratch_shapes=[
            pltpu.VMEM((M, H), jnp.float32),   # carried hidden state
            pltpu.VMEM((M, H), jnp.float32),   # per-layer attention context
        ],
        compiler_params=pltpu.CompilerParams(
            dimension_semantics=("arbitrary",)),   # layers are sequential
    )(emb, params["emb_ln_g"], params["emb_ln_b"],
      params["wqkv"], params["bqkv"], params["wo"], params["bo"],
      params["ln1_g"], params["ln1_b"],
      params["wi"], params["bi"], params["wf"], params["bf"],
      params["ln2_g"], params["ln2_b"])

    # TODO(synk): output_hidden_states (all-layer collection), pooler, dropout
    # and padding attention-mask are not modelled; the wrapper only consumes
    # the last hidden state and passes no mask, so outputs match.
    return out.reshape(B, S, H)


if __name__ == "__main__":
    key = jax.random.PRNGKey(0)
    pkey, ikey = jax.random.split(key)
    params = init_params(pkey, CFG)

    B, S = 2, 8
    x = jax.random.randint(ikey, (B, S), 0, CFG["vocab"], dtype=jnp.int32)

    out = jax.jit(partial(bert_forward, cfg=CFG))(x, params)
    out = jax.block_until_ready(out)

    assert out.shape == (B, S, CFG["hidden"]), out.shape
    assert jnp.all(jnp.isfinite(out))
    print("KERNEL_OK")
</pallas_src>

<mosaic_0001>
module attributes {stable_mosaic.version = 11 : i64} {
  func.func @_bert_encoder_kernel(%arg0: i32, %arg1: memref<16x32xf32, #tpu.memory_space<vmem>>, %arg2: memref<1x32xf32, #tpu.memory_space<vmem>>, %arg3: memref<1x32xf32, #tpu.memory_space<vmem>>, %arg4: memref<1x32x96xf32, #tpu.memory_space<vmem>>, %arg5: memref<1x1x96xf32, #tpu.memory_space<vmem>>, %arg6: memref<1x32x32xf32, #tpu.memory_space<vmem>>, %arg7: memref<1x1x32xf32, #tpu.memory_space<vmem>>, %arg8: memref<1x1x32xf32, #tpu.memory_space<vmem>>, %arg9: memref<1x1x32xf32, #tpu.memory_space<vmem>>, %arg10: memref<1x32x64xf32, #tpu.memory_space<vmem>>, %arg11: memref<1x1x64xf32, #tpu.memory_space<vmem>>, %arg12: memref<1x64x32xf32, #tpu.memory_space<vmem>>, %arg13: memref<1x1x32xf32, #tpu.memory_space<vmem>>, %arg14: memref<1x1x32xf32, #tpu.memory_space<vmem>>, %arg15: memref<1x1x32xf32, #tpu.memory_space<vmem>>, %arg16: memref<16x32xf32, #tpu.memory_space<vmem>>, %arg17: memref<16x32xf32, #tpu.memory_space<vmem>>, %arg18: memref<16x32xf32, #tpu.memory_space<vmem>>) attributes {dimension_semantics = [#tpu.dimension_semantics<arbitrary>], iteration_bounds = array<i64: 2>, scalar_prefetch = 0 : i64, scratch_operands = 2 : i64, tpu.core_type = #tpu.core_type<tc>, window_params = [{pipeline_mode = #tpu.pipeline_mode<synchronous>, transform_indices = @transform_0, window_bounds = array<i64: 16, 32>}, {pipeline_mode = #tpu.pipeline_mode<synchronous>, transform_indices = @transform_1, window_bounds = array<i64: 1, 32>}, {pipeline_mode = #tpu.pipeline_mode<synchronous>, transform_indices = @transform_2, window_bounds = array<i64: 1, 32>}, {transform_indices = @transform_3, window_bounds = array<i64: 1, 32, 96>}, {transform_indices = @transform_4, window_bounds = array<i64: 1, 1, 96>}, {transform_indices = @transform_5, window_bounds = array<i64: 1, 32, 32>}, {transform_indices = @transform_6, window_bounds = array<i64: 1, 1, 32>}, {transform_indices = @transform_7, window_bounds = array<i64: 1, 1, 32>}, {transform_indices = @transform_8, window_bounds = array<i64: 1, 1, 32>}, {transform_indices = @transform_9, window_bounds = array<i64: 1, 32, 64>}, {transform_indices = @transform_10, window_bounds = array<i64: 1, 1, 64>}, {transform_indices = @transform_11, window_bounds = array<i64: 1, 64, 32>}, {transform_indices = @transform_12, window_bounds = array<i64: 1, 1, 32>}, {transform_indices = @transform_13, window_bounds = array<i64: 1, 1, 32>}, {transform_indices = @transform_14, window_bounds = array<i64: 1, 1, 32>}, {pipeline_mode = #tpu.pipeline_mode<synchronous>, transform_indices = @transform_15, window_bounds = array<i64: 16, 32>}]} {
    %c0_i32 = arith.constant 0 : i32
    %0 = arith.cmpi eq, %arg0, %c0_i32 : i32
    %1 = arith.extui %0 : i1 to i32
    %c0_i32_0 = arith.constant 0 : i32
    %2 = arith.cmpi ne, %1, %c0_i32_0 : i32
    scf.if %2 {
      %c0_113 = arith.constant 0 : index
      %c0_114 = arith.constant 0 : index
      %252 = vector.load %arg1[%c0_113, %c0_114] : memref<16x32xf32, #tpu.memory_space<vmem>>, vector<16x32xf32>
      %c0_115 = arith.constant 0 : index
      %c0_116 = arith.constant 0 : index
      %253 = vector.load %arg2[%c0_115, %c0_116] : memref<1x32xf32, #tpu.memory_space<vmem>>, vector<1x32xf32>
      %c0_117 = arith.constant 0 : index
      %c0_118 = arith.constant 0 : index
      %254 = vector.load %arg3[%c0_117, %c0_118] : memref<1x32xf32, #tpu.memory_space<vmem>>, vector<1x32xf32>
      %cst_119 = arith.constant dense<0.000000e+00> : vector<16xf32>
      %255 = vector.multi_reduction <add>, %252, %cst_119 [1] : vector<16x32xf32> to vector<16xf32>
      %256 = vector.shape_cast %255 : vector<16xf32> to vector<16x1xf32>
      %cst_120 = arith.constant 3.200000e+01 : f32
      %257 = vector.broadcast %cst_120 : f32 to vector<16x1xf32>
      %258 = arith.divf %256, %257 : vector<16x1xf32>
      %259 = vector.broadcast %258 : vector<16x1xf32> to vector<16x32xf32>
      %260 = arith.subf %252, %259 : vector<16x32xf32>
      %261 = arith.mulf %260, %260 : vector<16x32xf32>
      %cst_121 = arith.constant dense<0.000000e+00> : vector<16xf32>
      %262 = vector.multi_reduction <add>, %261, %cst_121 [1] : vector<16x32xf32> to vector<16xf32>
      %263 = vector.shape_cast %262 : vector<16xf32> to vector<16x1xf32>
      %cst_122 = arith.constant 3.200000e+01 : f32
      %264 = vector.broadcast %cst_122 : f32 to vector<16x1xf32>
      %265 = arith.divf %263, %264 : vector<16x1xf32>
      %266 = vector.broadcast %258 : vector<16x1xf32> to vector<16x32xf32>
      %267 = arith.subf %252, %266 : vector<16x32xf32>
      %cst_123 = arith.constant 9.99999996E-13 : f32
      %268 = vector.broadcast %cst_123 : f32 to vector<16x1xf32>
      %269 = arith.addf %265, %268 : vector<16x1xf32>
      %270 = math.rsqrt %269 : vector<16x1xf32>
      %271 = vector.broadcast %270 : vector<16x1xf32> to vector<16x32xf32>
      %272 = arith.mulf %267, %271 : vector<16x32xf32>
      %273 = vector.broadcast %253 : vector<1x32xf32> to vector<16x32xf32>
      %274 = arith.mulf %272, %273 : vector<16x32xf32>
      %275 = vector.broadcast %254 : vector<1x32xf32> to vector<16x32xf32>
      %276 = arith.addf %274, %275 : vector<16x32xf32>
      %c0_124 = arith.constant 0 : index
      %c0_125 = arith.constant 0 : index
      %277 = vector.load %arg17[%c0_124, %c0_125] : memref<16x32xf32, #tpu.memory_space<vmem>>, vector<16x32xf32>
      tpu.vector_store %arg17[%c0_124, %c0_125], %276 {strides = array<i32>} : memref<16x32xf32, #tpu.memory_space<vmem>>, vector<16x32xf32>,
    } else {
    }
    %c0 = arith.constant 0 : index
    %c0_1 = arith.constant 0 : index
    %3 = vector.load %arg17[%c0, %c0_1] : memref<16x32xf32, #tpu.memory_space<vmem>>, vector<16x32xf32>
    %c0_2 = arith.constant 0 : index
    %c0_3 = arith.constant 0 : index
    %c0_4 = arith.constant 0 : index
    %4 = vector.load %arg4[%c0_2, %c0_3, %c0_4] : memref<1x32x96xf32, #tpu.memory_space<vmem>>, vector<1x32x96xf32>
    %5 = vector.shape_cast %4 : vector<1x32x96xf32> to vector<32x96xf32>
    %cst = arith.constant dense<0.000000e+00> : vector<16x96xf32>
    %6 = tpu.matmul %3, %5, %cst {dimension_numbers = #tpu.dot_dimension_numbers<[1], [0], [0], [1], [0, 0, 1, 1], [], []>} : vector<16x32xf32>, vector<32x96xf32>, vector<16x96xf32> -> vector<16x96xf32>
    %c0_5 = arith.constant 0 : index
    %c0_6 = arith.constant 0 : index
    %c0_7 = arith.constant 0 : index
    %7 = vector.load %arg5[%c0_5, %c0_6, %c0_7] : memref<1x1x96xf32, #tpu.memory_space<vmem>>, vector<1x1x96xf32>
    %8 = vector.shape_cast %7 : vector<1x1x96xf32> to vector<1x96xf32>
    %9 = vector.broadcast %8 : vector<1x96xf32> to vector<16x96xf32>
    %10 = arith.addf %6, %9 : vector<16x96xf32>
    %11 = vector.extract_strided_slice %10 {offsets = [0, 0], sizes = [16, 32], strides = [1, 1]} : vector<16x96xf32> to vector<16x32xf32>
    %12 = vector.extract_strided_slice %10 {offsets = [0, 32], sizes = [16, 32], strides = [1, 1]} : vector<16x96xf32> to vector<16x32xf32>
    %13 = vector.extract_strided_slice %10 {offsets = [0, 64], sizes = [16, 32], strides = [1, 1]} : vector<16x96xf32> to vector<16x32xf32>
    %14 = vector.extract_strided_slice %11 {offsets = [0, 0], sizes = [8, 8], strides = [1, 1]} : vector<16x32xf32> to vector<8x8xf32>
    %15 = vector.extract_strided_slice %12 {offsets = [0, 0], sizes = [8, 8], strides = [1, 1]} : vector<16x32xf32> to vector<8x8xf32>
    %16 = vector.extract_strided_slice %13 {offsets = [0, 0], sizes = [8, 8], strides = [1, 1]} : vector<16x32xf32> to vector<8x8xf32>
    %17 = tpu.transpose %15, [1, 0] : vector<8x8xf32> -> vector<8x8xf32>
    %cst_8 = arith.constant dense<0.000000e+00> : vector<8x8xf32>
    %18 = tpu.matmul %14, %17, %cst_8 {dimension_numbers = #tpu.dot_dimension_numbers<[1], [0], [0], [1], [0, 0, 1, 1], [], []>} : vector<8x8xf32>, vector<8x8xf32>, vector<8x8xf32> -> vector<8x8xf32>
    %cst_9 = arith.constant 0.353553385 : f32
    %19 = vector.broadcast %cst_9 : f32 to vector<8x8xf32>
    %20 = arith.mulf %18, %19 : vector<8x8xf32>
    %cst_10 = arith.constant dense<0xFF800000> : vector<8xf32>
    %21 = vector.multi_reduction <maximumf>, %20, %cst_10 [1] : vector<8x8xf32> to vector<8xf32>
    %22 = vector.shape_cast %21 : vector<8xf32> to vector<8x1xf32>
    %23 = vector.broadcast %22 : vector<8x1xf32> to vector<8x8xf32>
    %24 = arith.subf %20, %23 : vector<8x8xf32>
    %25 = math.exp %24 : vector<8x8xf32>
    %cst_11 = arith.constant dense<0.000000e+00> : vector<8xf32>
    %26 = vector.multi_reduction <add>, %25, %cst_11 [1] : vector<8x8xf32> to vector<8xf32>
    %27 = vector.shape_cast %26 : vector<8xf32> to vector<8x1xf32>
    %28 = tpu.reciprocal %27 {approx = true} : vector<8x1xf32> -> vector<8x1xf32>
    %29 = vector.broadcast %28 : vector<8x1xf32> to vector<8x8xf32>
    %30 = arith.mulf %25, %29 : vector<8x8xf32>
    %cst_12 = arith.constant dense<0.000000e+00> : vector<8x8xf32>
    %31 = tpu.matmul %30, %16, %cst_12 {dimension_numbers = #tpu.dot_dimension_numbers<[1], [0], [0], [1], [0, 0, 1, 1], [], []>} : vector<8x8xf32>, vector<8x8xf32>, vector<8x8xf32> -> vector<8x8xf32>
    %c0_13 = arith.constant 0 : index
    %c0_14 = arith.constant 0 : index
    %32 = vector.load %arg18[%c0_13, %c0_14] : memref<16x32xf32, #tpu.memory_space<vmem>>, vector<8x8xf32>
    tpu.vector_store %arg18[%c0_13, %c0_14], %31 {strides = array<i32>} : memref<16x32xf32, #tpu.memory_space<vmem>>, vector<8x8xf32>,
    %33 = vector.extract_strided_slice %11 {offsets = [0, 8], sizes = [8, 8], strides = [1, 1]} : vector<16x32xf32> to vector<8x8xf32>
    %34 = vector.extract_strided_slice %12 {offsets = [0, 8], sizes = [8, 8], strides = [1, 1]} : vector<16x32xf32> to vector<8x8xf32>
    %35 = vector.extract_strided_slice %13 {offsets = [0, 8], sizes = [8, 8], strides = [1, 1]} : vector<16x32xf32> to vector<8x8xf32>
    %36 = tpu.transpose %34, [1, 0] : vector<8x8xf32> -> vector<8x8xf32>
    %cst_15 = arith.constant dense<0.000000e+00> : vector<8x8xf32>
    %37 = tpu.matmul %33, %36, %cst_15 {dimension_numbers = #tpu.dot_dimension_numbers<[1], [0], [0], [1], [0, 0, 1, 1], [], []>} : vector<8x8xf32>, vector<8x8xf32>, vector<8x8xf32> -> vector<8x8xf32>
    %cst_16 = arith.constant 0.353553385 : f32
    %38 = vector.broadcast %cst_16 : f32 to vector<8x8xf32>
    %39 = arith.mulf %37, %38 : vector<8x8xf32>
    %cst_17 = arith.constant dense<0xFF800000> : vector<8xf32>
    %40 = vector.multi_reduction <maximumf>, %39, %cst_17 [1] : vector<8x8xf32> to vector<8xf32>
    %41 = vector.shape_cast %40 : vector<8xf32> to vector<8x1xf32>
    %42 = vector.broadcast %41 : vector<8x1xf32> to vector<8x8xf32>
    %43 = arith.subf %39, %42 : vector<8x8xf32>
    %44 = math.exp %43 : vector<8x8xf32>
    %cst_18 = arith.constant dense<0.000000e+00> : vector<8xf32>
    %45 = vector.multi_reduction <add>, %44, %cst_18 [1] : vector<8x8xf32> to vector<8xf32>
    %46 = vector.shape_cast %45 : vector<8xf32> to vector<8x1xf32>
    %47 = tpu.reciprocal %46 {approx = true} : vector<8x1xf32> -> vector<8x1xf32>
    %48 = vector.broadcast %47 : vector<8x1xf32> to vector<8x8xf32>
    %49 = arith.mulf %44, %48 : vector<8x8xf32>
    %cst_19 = arith.constant dense<0.000000e+00> : vector<8x8xf32>
    %50 = tpu.matmul %49, %35, %cst_19 {dimension_numbers = #tpu.dot_dimension_numbers<[1], [0], [0], [1], [0, 0, 1, 1], [], []>} : vector<8x8xf32>, vector<8x8xf32>, vector<8x8xf32> -> vector<8x8xf32>
    %c0_20 = arith.constant 0 : index
    %c8 = arith.constant 8 : index
    %51 = vector.load %arg18[%c0_20, %c8] : memref<16x32xf32, #tpu.memory_space<vmem>>, vector<8x8xf32>
    tpu.vector_store %arg18[%c0_20, %c8], %50 {strides = array<i32>} : memref<16x32xf32, #tpu.memory_space<vmem>>, vector<8x8xf32>,
    %52 = vector.extract_strided_slice %11 {offsets = [0, 16], sizes = [8, 8], strides = [1, 1]} : vector<16x32xf32> to vector<8x8xf32>
    %53 = vector.extract_strided_slice %12 {offsets = [0, 16], sizes = [8, 8], strides = [1, 1]} : vector<16x32xf32> to vector<8x8xf32>
    %54 = vector.extract_strided_slice %13 {offsets = [0, 16], sizes = [8, 8], strides = [1, 1]} : vector<16x32xf32> to vector<8x8xf32>
    %55 = tpu.transpose %53, [1, 0] : vector<8x8xf32> -> vector<8x8xf32>
    %cst_21 = arith.constant dense<0.000000e+00> : vector<8x8xf32>
    %56 = tpu.matmul %52, %55, %cst_21 {dimension_numbers = #tpu.dot_dimension_numbers<[1], [0], [0], [1], [0, 0, 1, 1], [], []>} : vector<8x8xf32>, vector<8x8xf32>, vector<8x8xf32> -> vector<8x8xf32>
    %cst_22 = arith.constant 0.353553385 : f32
    %57 = vector.broadcast %cst_22 : f32 to vector<8x8xf32>
    %58 = arith.mulf %56, %57 : vector<8x8xf32>
    %cst_23 = arith.constant dense<0xFF800000> : vector<8xf32>
    %59 = vector.multi_reduction <maximumf>, %58, %cst_23 [1] : vector<8x8xf32> to vector<8xf32>
    %60 = vector.shape_cast %59 : vector<8xf32> to vector<8x1xf32>
    %61 = vector.broadcast %60 : vector<8x1xf32> to vector<8x8xf32>
    %62 = arith.subf %58, %61 : vector<8x8xf32>
    %63 = math.exp %62 : vector<8x8xf32>
    %cst_24 = arith.constant dense<0.000000e+00> : vector<8xf32>
    %64 = vector.multi_reduction <add>, %63, %cst_24 [1] : vector<8x8xf32> to vector<8xf32>
    %65 = vector.shape_cast %64 : vector<8xf32> to vector<8x1xf32>
    %66 = tpu.reciprocal %65 {approx = true} : vector<8x1xf32> -> vector<8x1xf32>
    %67 = vector.broadcast %66 : vector<8x1xf32> to vector<8x8xf32>
    %68 = arith.mulf %63, %67 : vector<8x8xf32>
    %cst_25 = arith.constant dense<0.000000e+00> : vector<8x8xf32>
    %69 = tpu.matmul %68, %54, %cst_25 {dimension_numbers = #tpu.dot_dimension_numbers<[1], [0], [0], [1], [0, 0, 1, 1], [], []>} : vector<8x8xf32>, vector<8x8xf32>, vector<8x8xf32> -> vector<8x8xf32>
    %c0_26 = arith.constant 0 : index
    %c16 = arith.constant 16 : index
    %70 = vector.load %arg18[%c0_26, %c16] : memref<16x32xf32, #tpu.memory_space<vmem>>, vector<8x8xf32>
    tpu.vector_store %arg18[%c0_26, %c16], %69 {strides = array<i32>} : memref<16x32xf32, #tpu.memory_space<vmem>>, vector<8x8xf32>,
    %71 = vector.extract_strided_slice %11 {offsets = [0, 24], sizes = [8, 8], strides = [1, 1]} : vector<16x32xf32> to vector<8x8xf32>
    %72 = vector.extract_strided_slice %12 {offsets = [0, 24], sizes = [8, 8], strides = [1, 1]} : vector<16x32xf32> to vector<8x8xf32>
    %73 = vector.extract_strided_slice %13 {offsets = [0, 24], sizes = [8, 8], strides = [1, 1]} : vector<16x32xf32> to vector<8x8xf32>
    %74 = tpu.transpose %72, [1, 0] : vector<8x8xf32> -> vector<8x8xf32>
    %cst_27 = arith.constant dense<0.000000e+00> : vector<8x8xf32>
    %75 = tpu.matmul %71, %74, %cst_27 {dimension_numbers = #tpu.dot_dimension_numbers<[1], [0], [0], [1], [0, 0, 1, 1], [], []>} : vector<8x8xf32>, vector<8x8xf32>, vector<8x8xf32> -> vector<8x8xf32>
    %cst_28 = arith.constant 0.353553385 : f32
    %76 = vector.broadcast %cst_28 : f32 to vector<8x8xf32>
    %77 = arith.mulf %75, %76 : vector<8x8xf32>
    %cst_29 = arith.constant dense<0xFF800000> : vector<8xf32>
    %78 = vector.multi_reduction <maximumf>, %77, %cst_29 [1] : vector<8x8xf32> to vector<8xf32>
    %79 = vector.shape_cast %78 : vector<8xf32> to vector<8x1xf32>
    %80 = vector.broadcast %79 : vector<8x1xf32> to vector<8x8xf32>
    %81 = arith.subf %77, %80 : vector<8x8xf32>
    %82 = math.exp %81 : vector<8x8xf32>
    %cst_30 = arith.constant dense<0.000000e+00> : vector<8xf32>
    %83 = vector.multi_reduction <add>, %82, %cst_30 [1] : vector<8x8xf32> to vector<8xf32>
    %84 = vector.shape_cast %83 : vector<8xf32> to vector<8x1xf32>
    %85 = tpu.reciprocal %84 {approx = true} : vector<8x1xf32> -> vector<8x1xf32>
    %86 = vector.broadcast %85 : vector<8x1xf32> to vector<8x8xf32>
    %87 = arith.mulf %82, %86 : vector<8x8xf32>
    %cst_31 = arith.constant dense<0.000000e+00> : vector<8x8xf32>
    %88 = tpu.matmul %87, %73, %cst_31 {dimension_numbers = #tpu.dot_dimension_numbers<[1], [0], [0], [1], [0, 0, 1, 1], [], []>} : vector<8x8xf32>, vector<8x8xf32>, vector<8x8xf32> -> vector<8x8xf32>
    %c0_32 = arith.constant 0 : index
    %c24 = arith.constant 24 : index
    %89 = vector.load %arg18[%c0_32, %c24] : memref<16x32xf32, #tpu.memory_space<vmem>>, vector<8x8xf32>
    tpu.vector_store %arg18[%c0_32, %c24], %88 {strides = array<i32>} : memref<16x32xf32, #tpu.memory_space<vmem>>, vector<8x8xf32>,
    %90 = vector.extract_strided_slice %11 {offsets = [8, 0], sizes = [8, 8], strides = [1, 1]} : vector<16x32xf32> to vector<8x8xf32>
    %91 = vector.extract_strided_slice %12 {offsets = [8, 0], sizes = [8, 8], strides = [1, 1]} : vector<16x32xf32> to vector<8x8xf32>
    %92 = vector.extract_strided_slice %13 {offsets = [8, 0], sizes = [8, 8], strides = [1, 1]} : vector<16x32xf32> to vector<8x8xf32>
    %93 = tpu.transpose %91, [1, 0] : vector<8x8xf32> -> vector<8x8xf32>
    %cst_33 = arith.constant dense<0.000000e+00> : vector<8x8xf32>
    %94 = tpu.matmul %90, %93, %cst_33 {dimension_numbers = #tpu.dot_dimension_numbers<[1], [0], [0], [1], [0, 0, 1, 1], [], []>} : vector<8x8xf32>, vector<8x8xf32>, vector<8x8xf32> -> vector<8x8xf32>
    %cst_34 = arith.constant 0.353553385 : f32
    %95 = vector.broadcast %cst_34 : f32 to vector<8x8xf32>
    %96 = arith.mulf %94, %95 : vector<8x8xf32>
    %cst_35 = arith.constant dense<0xFF800000> : vector<8xf32>
    %97 = vector.multi_reduction <maximumf>, %96, %cst_35 [1] : vector<8x8xf32> to vector<8xf32>
    %98 = vector.shape_cast %97 : vector<8xf32> to vector<8x1xf32>
    %99 = vector.broadcast %98 : vector<8x1xf32> to vector<8x8xf32>
    %100 = arith.subf %96, %99 : vector<8x8xf32>
    %101 = math.exp %100 : vector<8x8xf32>
    %cst_36 = arith.constant dense<0.000000e+00> : vector<8xf32>
    %102 = vector.multi_reduction <add>, %101, %cst_36 [1] : vector<8x8xf32> to vector<8xf32>
    %103 = vector.shape_cast %102 : vector<8xf32> to vector<8x1xf32>
    %104 = tpu.reciprocal %103 {approx = true} : vector<8x1xf32> -> vector<8x1xf32>
    %105 = vector.broadcast %104 : vector<8x1xf32> to vector<8x8xf32>
    %106 = arith.mulf %101, %105 : vector<8x8xf32>
    %cst_37 = arith.constant dense<0.000000e+00> : vector<8x8xf32>
    %107 = tpu.matmul %106, %92, %cst_37 {dimension_numbers = #tpu.dot_dimension_numbers<[1], [0], [0], [1], [0, 0, 1, 1], [], []>} : vector<8x8xf32>, vector<8x8xf32>, vector<8x8xf32> -> vector<8x8xf32>
    %c8_38 = arith.constant 8 : index
    %c0_39 = arith.constant 0 : index
    %108 = vector.load %arg18[%c8_38, %c0_39] : memref<16x32xf32, #tpu.memory_space<vmem>>, vector<8x8xf32>
    tpu.vector_store %arg18[%c8_38, %c0_39], %107 {strides = array<i32>} : memref<16x32xf32, #tpu.memory_space<vmem>>, vector<8x8xf32>,
    %109 = vector.extract_strided_slice %11 {offsets = [8, 8], sizes = [8, 8], strides = [1, 1]} : vector<16x32xf32> to vector<8x8xf32>
    %110 = vector.extract_strided_slice %12 {offsets = [8, 8], sizes = [8, 8], strides = [1, 1]} : vector<16x32xf32> to vector<8x8xf32>
    %111 = vector.extract_strided_slice %13 {offsets = [8, 8], sizes = [8, 8], strides = [1, 1]} : vector<16x32xf32> to vector<8x8xf32>
    %112 = tpu.transpose %110, [1, 0] : vector<8x8xf32> -> vector<8x8xf32>
    %cst_40 = arith.constant dense<0.000000e+00> : vector<8x8xf32>
    %113 = tpu.matmul %109, %112, %cst_40 {dimension_numbers = #tpu.dot_dimension_numbers<[1], [0], [0], [1], [0, 0, 1, 1], [], []>} : vector<8x8xf32>, vector<8x8xf32>, vector<8x8xf32> -> vector<8x8xf32>
    %cst_41 = arith.constant 0.353553385 : f32
    %114 = vector.broadcast %cst_41 : f32 to vector<8x8xf32>
    %115 = arith.mulf %113, %114 : vector<8x8xf32>
    %cst_42 = arith.constant dense<0xFF800000> : vector<8xf32>
    %116 = vector.multi_reduction <maximumf>, %115, %cst_42 [1] : vector<8x8xf32> to vector<8xf32>
    %117 = vector.shape_cast %116 : vector<8xf32> to vector<8x1xf32>
    %118 = vector.broadcast %117 : vector<8x1xf32> to vector<8x8xf32>
    %119 = arith.subf %115, %118 : vector<8x8xf32>
    %120 = math.exp %119 : vector<8x8xf32>
    %cst_43 = arith.constant dense<0.000000e+00> : vector<8xf32>
    %121 = vector.multi_reduction <add>, %120, %cst_43 [1] : vector<8x8xf32> to vector<8xf32>
    %122 = vector.shape_cast %121 : vector<8xf32> to vector<8x1xf32>
    %123 = tpu.reciprocal %122 {approx = true} : vector<8x1xf32> -> vector<8x1xf32>
    %124 = vector.broadcast %123 : vector<8x1xf32> to vector<8x8xf32>
    %125 = arith.mulf %120, %124 : vector<8x8xf32>
    %cst_44 = arith.constant dense<0.000000e+00> : vector<8x8xf32>
    %126 = tpu.matmul %125, %111, %cst_44 {dimension_numbers = #tpu.dot_dimension_numbers<[1], [0], [0], [1], [0, 0, 1, 1], [], []>} : vector<8x8xf32>, vector<8x8xf32>, vector<8x8xf32> -> vector<8x8xf32>
    %c8_45 = arith.constant 8 : index
    %c8_46 = arith.constant 8 : index
    %127 = vector.load %arg18[%c8_45, %c8_46] : memref<16x32xf32, #tpu.memory_space<vmem>>, vector<8x8xf32>
    tpu.vector_store %arg18[%c8_45, %c8_46], %126 {strides = array<i32>} : memref<16x32xf32, #tpu.memory_space<vmem>>, vector<8x8xf32>,
    %128 = vector.extract_strided_slice %11 {offsets = [8, 16], sizes = [8, 8], strides = [1, 1]} : vector<16x32xf32> to vector<8x8xf32>
    %129 = vector.extract_strided_slice %12 {offsets = [8, 16], sizes = [8, 8], strides = [1, 1]} : vector<16x32xf32> to vector<8x8xf32>
    %130 = vector.extract_strided_slice %13 {offsets = [8, 16], sizes = [8, 8], strides = [1, 1]} : vector<16x32xf32> to vector<8x8xf32>
    %131 = tpu.transpose %129, [1, 0] : vector<8x8xf32> -> vector<8x8xf32>
    %cst_47 = arith.constant dense<0.000000e+00> : vector<8x8xf32>
    %132 = tpu.matmul %128, %131, %cst_47 {dimension_numbers = #tpu.dot_dimension_numbers<[1], [0], [0], [1], [0, 0, 1, 1], [], []>} : vector<8x8xf32>, vector<8x8xf32>, vector<8x8xf32> -> vector<8x8xf32>
    %cst_48 = arith.constant 0.353553385 : f32
    %133 = vector.broadcast %cst_48 : f32 to vector<8x8xf32>
    %134 = arith.mulf %132, %133 : vector<8x8xf32>
    %cst_49 = arith.constant dense<0xFF800000> : vector<8xf32>
    %135 = vector.multi_reduction <maximumf>, %134, %cst_49 [1] : vector<8x8xf32> to vector<8xf32>
    %136 = vector.shape_cast %135 : vector<8xf32> to vector<8x1xf32>
    %137 = vector.broadcast %136 : vector<8x1xf32> to vector<8x8xf32>
    %138 = arith.subf %134, %137 : vector<8x8xf32>
    %139 = math.exp %138 : vector<8x8xf32>
    %cst_50 = arith.constant dense<0.000000e+00> : vector<8xf32>
    %140 = vector.multi_reduction <add>, %139, %cst_50 [1] : vector<8x8xf32> to vector<8xf32>
    %141 = vector.shape_cast %140 : vector<8xf32> to vector<8x1xf32>
    %142 = tpu.reciprocal %141 {approx = true} : vector<8x1xf32> -> vector<8x1xf32>
    %143 = vector.broadcast %142 : vector<8x1xf32> to vector<8x8xf32>
    %144 = arith.mulf %139, %143 : vector<8x8xf32>
    %cst_51 = arith.constant dense<0.000000e+00> : vector<8x8xf32>
    %145 = tpu.matmul %144, %130, %cst_51 {dimension_numbers = #tpu.dot_dimension_numbers<[1], [0], [0], [1], [0, 0, 1, 1], [], []>} : vector<8x8xf32>, vector<8x8xf32>, vector<8x8xf32> -> vector<8x8xf32>
    %c8_52 = arith.constant 8 : index
    %c16_53 = arith.constant 16 : index
    %146 = vector.load %arg18[%c8_52, %c16_53] : memref<16x32xf32, #tpu.memory_space<vmem>>, vector<8x8xf32>
    tpu.vector_store %arg18[%c8_52, %c16_53], %145 {strides = array<i32>} : memref<16x32xf32, #tpu.memory_space<vmem>>, vector<8x8xf32>,
    %147 = vector.extract_strided_slice %11 {offsets = [8, 24], sizes = [8, 8], strides = [1, 1]} : vector<16x32xf32> to vector<8x8xf32>
    %148 = vector.extract_strided_slice %12 {offsets = [8, 24], sizes = [8, 8], strides = [1, 1]} : vector<16x32xf32> to vector<8x8xf32>
    %149 = vector.extract_strided_slice %13 {offsets = [8, 24], sizes = [8, 8], strides = [1, 1]} : vector<16x32xf32> to vector<8x8xf32>
    %150 = tpu.transpose %148, [1, 0] : vector<8x8xf32> -> vector<8x8xf32>
    %cst_54 = arith.constant dense<0.000000e+00> : vector<8x8xf32>
    %151 = tpu.matmul %147, %150, %cst_54 {dimension_numbers = #tpu.dot_dimension_numbers<[1], [0], [0], [1], [0, 0, 1, 1], [], []>} : vector<8x8xf32>, vector<8x8xf32>, vector<8x8xf32> -> vector<8x8xf32>
    %cst_55 = arith.constant 0.353553385 : f32
    %152 = vector.broadcast %cst_55 : f32 to vector<8x8xf32>
    %153 = arith.mulf %151, %152 : vector<8x8xf32>
    %cst_56 = arith.constant dense<0xFF800000> : vector<8xf32>
    %154 = vector.multi_reduction <maximumf>, %153, %cst_56 [1] : vector<8x8xf32> to vector<8xf32>
    %155 = vector.shape_cast %154 : vector<8xf32> to vector<8x1xf32>
    %156 = vector.broadcast %155 : vector<8x1xf32> to vector<8x8xf32>
    %157 = arith.subf %153, %156 : vector<8x8xf32>
    %158 = math.exp %157 : vector<8x8xf32>
    %cst_57 = arith.constant dense<0.000000e+00> : vector<8xf32>
    %159 = vector.multi_reduction <add>, %158, %cst_57 [1] : vector<8x8xf32> to vector<8xf32>
    %160 = vector.shape_cast %159 : vector<8xf32> to vector<8x1xf32>
    %161 = tpu.reciprocal %160 {approx = true} : vector<8x1xf32> -> vector<8x1xf32>
    %162 = vector.broadcast %161 : vector<8x1xf32> to vector<8x8xf32>
    %163 = arith.mulf %158, %162 : vector<8x8xf32>
    %cst_58 = arith.constant dense<0.000000e+00> : vector<8x8xf32>
    %164 = tpu.matmul %163, %149, %cst_58 {dimension_numbers = #tpu.dot_dimension_numbers<[1], [0], [0], [1], [0, 0, 1, 1], [], []>} : vector<8x8xf32>, vector<8x8xf32>, vector<8x8xf32> -> vector<8x8xf32>
    %c8_59 = arith.constant 8 : index
    %c24_60 = arith.constant 24 : index
    %165 = vector.load %arg18[%c8_59, %c24_60] : memref<16x32xf32, #tpu.memory_space<vmem>>, vector<8x8xf32>
    tpu.vector_store %arg18[%c8_59, %c24_60], %164 {strides = array<i32>} : memref<16x32xf32, #tpu.memory_space<vmem>>, vector<8x8xf32>,
    %c0_61 = arith.constant 0 : index
    %c0_62 = arith.constant 0 : index
    %166 = vector.load %arg18[%c0_61, %c0_62] : memref<16x32xf32, #tpu.memory_space<vmem>>, vector<16x32xf32>
    %c0_63 = arith.constant 0 : index
    %c0_64 = arith.constant 0 : index
    %c0_65 = arith.constant 0 : index
    %167 = vector.load %arg6[%c0_63, %c0_64, %c0_65] : memref<1x32x32xf32, #tpu.memory_space<vmem>>, vector<1x32x32xf32>
    %168 = vector.shape_cast %167 : vector<1x32x32xf32> to vector<32x32xf32>
    %cst_66 = arith.constant dense<0.000000e+00> : vector<16x32xf32>
    %169 = tpu.matmul %166, %168, %cst_66 {dimension_numbers = #tpu.dot_dimension_numbers<[1], [0], [0], [1], [0, 0, 1, 1], [], []>} : vector<16x32xf32>, vector<32x32xf32>, vector<16x32xf32> -> vector<16x32xf32>
    %c0_67 = arith.constant 0 : index
    %c0_68 = arith.constant 0 : index
    %c0_69 = arith.constant 0 : index
    %170 = vector.load %arg7[%c0_67, %c0_68, %c0_69] : memref<1x1x32xf32, #tpu.memory_space<vmem>>, vector<1x1x32xf32>
    %171 = vector.shape_cast %170 : vector<1x1x32xf32> to vector<1x32xf32>
    %172 = vector.broadcast %171 : vector<1x32xf32> to vector<16x32xf32>
    %173 = arith.addf %169, %172 : vector<16x32xf32>
    %174 = arith.addf %173, %3 : vector<16x32xf32>
    %c0_70 = arith.constant 0 : index
    %c0_71 = arith.constant 0 : index
    %c0_72 = arith.constant 0 : index
    %175 = vector.load %arg8[%c0_70, %c0_71, %c0_72] : memref<1x1x32xf32, #tpu.memory_space<vmem>>, vector<1x1x32xf32>
    %176 = vector.shape_cast %175 : vector<1x1x32xf32> to vector<1x32xf32>
    %c0_73 = arith.constant 0 : index
    %c0_74 = arith.constant 0 : index
    %c0_75 = arith.constant 0 : index
    %177 = vector.load %arg9[%c0_73, %c0_74, %c0_75] : memref<1x1x32xf32, #tpu.memory_space<vmem>>, vector<1x1x32xf32>
    %178 = vector.shape_cast %177 : vector<1x1x32xf32> to vector<1x32xf32>
    %cst_76 = arith.constant dense<0.000000e+00> : vector<16xf32>
    %179 = vector.multi_reduction <add>, %174, %cst_76 [1] : vector<16x32xf32> to vector<16xf32>
    %180 = vector.shape_cast %179 : vector<16xf32> to vector<16x1xf32>
    %cst_77 = arith.constant 3.200000e+01 : f32
    %181 = vector.broadcast %cst_77 : f32 to vector<16x1xf32>
    %182 = arith.divf %180, %181 : vector<16x1xf32>
    %183 = vector.broadcast %182 : vector<16x1xf32> to vector<16x32xf32>
    %184 = arith.subf %174, %183 : vector<16x32xf32>
    %185 = arith.mulf %184, %184 : vector<16x32xf32>
    %cst_78 = arith.constant dense<0.000000e+00> : vector<16xf32>
    %186 = vector.multi_reduction <add>, %185, %cst_78 [1] : vector<16x32xf32> to vector<16xf32>
    %187 = vector.shape_cast %186 : vector<16xf32> to vector<16x1xf32>
    %cst_79 = arith.constant 3.200000e+01 : f32
    %188 = vector.broadcast %cst_79 : f32 to vector<16x1xf32>
    %189 = arith.divf %187, %188 : vector<16x1xf32>
    %190 = vector.broadcast %182 : vector<16x1xf32> to vector<16x32xf32>
    %191 = arith.subf %174, %190 : vector<16x32xf32>
    %cst_80 = arith.constant 9.99999996E-13 : f32
    %192 = vector.broadcast %cst_80 : f32 to vector<16x1xf32>
    %193 = arith.addf %189, %192 : vector<16x1xf32>
    %194 = math.rsqrt %193 : vector<16x1xf32>
    %195 = vector.broadcast %194 : vector<16x1xf32> to vector<16x32xf32>
    %196 = arith.mulf %191, %195 : vector<16x32xf32>
    %197 = vector.broadcast %176 : vector<1x32xf32> to vector<16x32xf32>
    %198 = arith.mulf %196, %197 : vector<16x32xf32>
    %199 = vector.broadcast %178 : vector<1x32xf32> to vector<16x32xf32>
    %200 = arith.addf %198, %199 : vector<16x32xf32>
    %c0_81 = arith.constant 0 : index
    %c0_82 = arith.constant 0 : index
    %c0_83 = arith.constant 0 : index
    %201 = vector.load %arg10[%c0_81, %c0_82, %c0_83] : memref<1x32x64xf32, #tpu.memory_space<vmem>>, vector<1x32x64xf32>
    %202 = vector.shape_cast %201 : vector<1x32x64xf32> to vector<32x64xf32>
    %cst_84 = arith.constant dense<0.000000e+00> : vector<16x64xf32>
    %203 = tpu.matmul %200, %202, %cst_84 {dimension_numbers = #tpu.dot_dimension_numbers<[1], [0], [0], [1], [0, 0, 1, 1], [], []>} : vector<16x32xf32>, vector<32x64xf32>, vector<16x64xf32> -> vector<16x64xf32>
    %c0_85 = arith.constant 0 : index
    %c0_86 = arith.constant 0 : index
    %c0_87 = arith.constant 0 : index
    %204 = vector.load %arg11[%c0_85, %c0_86, %c0_87] : memref<1x1x64xf32, #tpu.memory_space<vmem>>, vector<1x1x64xf32>
    %205 = vector.shape_cast %204 : vector<1x1x64xf32> to vector<1x64xf32>
    %206 = vector.broadcast %205 : vector<1x64xf32> to vector<16x64xf32>
    %207 = arith.addf %203, %206 : vector<16x64xf32>
    %cst_88 = arith.constant 5.000000e-01 : f32
    %208 = vector.broadcast %cst_88 : f32 to vector<16x64xf32>
    %209 = arith.mulf %208, %207 : vector<16x64xf32>
    %cst_89 = arith.constant 0.707106769 : f32
    %210 = vector.broadcast %cst_89 : f32 to vector<16x64xf32>
    %211 = arith.mulf %207, %210 : vector<16x64xf32>
    %212 = math.erf %211 : vector<16x64xf32>
    %cst_90 = arith.constant 1.000000e+00 : f32
    %213 = vector.broadcast %cst_90 : f32 to vector<16x64xf32>
    %214 = arith.addf %213, %212 : vector<16x64xf32>
    %215 = arith.mulf %209, %214 : vector<16x64xf32>
    %c0_91 = arith.constant 0 : index
    %c0_92 = arith.constant 0 : index
    %c0_93 = arith.constant 0 : index
    %216 = vector.load %arg12[%c0_91, %c0_92, %c0_93] : memref<1x64x32xf32, #tpu.memory_space<vmem>>, vector<1x64x32xf32>
    %217 = vector.shape_cast %216 : vector<1x64x32xf32> to vector<64x32xf32>
    %cst_94 = arith.constant dense<0.000000e+00> : vector<16x32xf32>
    %218 = tpu.matmul %215, %217, %cst_94 {dimension_numbers = #tpu.dot_dimension_numbers<[1], [0], [0], [1], [0, 0, 1, 1], [], []>} : vector<16x64xf32>, vector<64x32xf32>, vector<16x32xf32> -> vector<16x32xf32>
    %c0_95 = arith.constant 0 : index
    %c0_96 = arith.constant 0 : index
    %c0_97 = arith.constant 0 : index
    %219 = vector.load %arg13[%c0_95, %c0_96, %c0_97] : memref<1x1x32xf32, #tpu.memory_space<vmem>>, vector<1x1x32xf32>
    %220 = vector.shape_cast %219 : vector<1x1x32xf32> to vector<1x32xf32>
    %221 = vector.broadcast %220 : vector<1x32xf32> to vector<16x32xf32>
    %222 = arith.addf %218, %221 : vector<16x32xf32>
    %223 = arith.addf %222, %200 : vector<16x32xf32>
    %c0_98 = arith.constant 0 : index
    %c0_99 = arith.constant 0 : index
    %c0_100 = arith.constant 0 : index
    %224 = vector.load %arg14[%c0_98, %c0_99, %c0_100] : memref<1x1x32xf32, #tpu.memory_space<vmem>>, vector<1x1x32xf32>
    %225 = vector.shape_cast %224 : vector<1x1x32xf32> to vector<1x32xf32>
    %c0_101 = arith.constant 0 : index
    %c0_102 = arith.constant 0 : index
    %c0_103 = arith.constant 0 : index
    %226 = vector.load %arg15[%c0_101, %c0_102, %c0_103] : memref<1x1x32xf32, #tpu.memory_space<vmem>>, vector<1x1x32xf32>
    %227 = vector.shape_cast %226 : vector<1x1x32xf32> to vector<1x32xf32>
    %cst_104 = arith.constant dense<0.000000e+00> : vector<16xf32>
    %228 = vector.multi_reduction <add>, %223, %cst_104 [1] : vector<16x32xf32> to vector<16xf32>
    %229 = vector.shape_cast %228 : vector<16xf32> to vector<16x1xf32>
    %cst_105 = arith.constant 3.200000e+01 : f32
    %230 = vector.broadcast %cst_105 : f32 to vector<16x1xf32>
    %231 = arith.divf %229, %230 : vector<16x1xf32>
    %232 = vector.broadcast %231 : vector<16x1xf32> to vector<16x32xf32>
    %233 = arith.subf %223, %232 : vector<16x32xf32>
    %234 = arith.mulf %233, %233 : vector<16x32xf32>
    %cst_106 = arith.constant dense<0.000000e+00> : vector<16xf32>
    %235 = vector.multi_reduction <add>, %234, %cst_106 [1] : vector<16x32xf32> to vector<16xf32>
    %236 = vector.shape_cast %235 : vector<16xf32> to vector<16x1xf32>
    %cst_107 = arith.constant 3.200000e+01 : f32
    %237 = vector.broadcast %cst_107 : f32 to vector<16x1xf32>
    %238 = arith.divf %236, %237 : vector<16x1xf32>
    %239 = vector.broadcast %231 : vector<16x1xf32> to vector<16x32xf32>
    %240 = arith.subf %223, %239 : vector<16x32xf32>
    %cst_108 = arith.constant 9.99999996E-13 : f32
    %241 = vector.broadcast %cst_108 : f32 to vector<16x1xf32>
    %242 = arith.addf %238, %241 : vector<16x1xf32>
    %243 = math.rsqrt %242 : vector<16x1xf32>
    %244 = vector.broadcast %243 : vector<16x1xf32> to vector<16x32xf32>
    %245 = arith.mulf %240, %244 : vector<16x32xf32>
    %246 = vector.broadcast %225 : vector<1x32xf32> to vector<16x32xf32>
    %247 = arith.mulf %245, %246 : vector<16x32xf32>
    %248 = vector.broadcast %227 : vector<1x32xf32> to vector<16x32xf32>
    %249 = arith.addf %247, %248 : vector<16x32xf32>
    %c0_109 = arith.constant 0 : index
    %c0_110 = arith.constant 0 : index
    %250 = vector.load %arg17[%c0_109, %c0_110] : memref<16x32xf32, #tpu.memory_space<vmem>>, vector<16x32xf32>
    tpu.vector_store %arg17[%c0_109, %c0_110], %249 {strides = array<i32>} : memref<16x32xf32, #tpu.memory_space<vmem>>, vector<16x32xf32>,
    %c0_111 = arith.constant 0 : index
    %c0_112 = arith.constant 0 : index
    %251 = vector.load %arg16[%c0_111, %c0_112] : memref<16x32xf32, #tpu.memory_space<vmem>>, vector<16x32xf32>
    tpu.vector_store %arg16[%c0_111, %c0_112], %249 {strides = array<i32>} : memref<16x32xf32, #tpu.memory_space<vmem>>, vector<16x32xf32>,
    return
  }
  func.func @transform_0(%arg0: i32) -> (i32, i32) {
    %c0_i32 = arith.constant 0 : i32
    %c0_i32_0 = arith.constant 0 : i32
    %c0_i32_1 = arith.constant 0 : i32
    return %c0_i32, %c0_i32_0 : i32, i32
  }
  func.func @transform_1(%arg0: i32) -> (i32, i32) {
    %c0_i32 = arith.constant 0 : i32
    %c0_i32_0 = arith.constant 0 : i32
    %c0_i32_1 = arith.constant 0 : i32
    return %c0_i32, %c0_i32_0 : i32, i32
  }
  func.func @transform_2(%arg0: i32) -> (i32, i32) {
    %c0_i32 = arith.constant 0 : i32
    %c0_i32_0 = arith.constant 0 : i32
    %c0_i32_1 = arith.constant 0 : i32
    return %c0_i32, %c0_i32_0 : i32, i32
  }
  func.func @transform_3(%arg0: i32) -> (i32, i32, i32) {
    %c0_i32 = arith.constant 0 : i32
    %c0_i32_0 = arith.constant 0 : i32
    %c0_i32_1 = arith.constant 0 : i32
    return %arg0, %c0_i32, %c0_i32_0 : i32, i32, i32
  }
  func.func @transform_4(%arg0: i32) -> (i32, i32, i32) {
    %c0_i32 = arith.constant 0 : i32
    %c0_i32_0 = arith.constant 0 : i32
    %c0_i32_1 = arith.constant 0 : i32
    return %arg0, %c0_i32, %c0_i32_0 : i32, i32, i32
  }
  func.func @transform_5(%arg0: i32) -> (i32, i32, i32) {
    %c0_i32 = arith.constant 0 : i32
    %c0_i32_0 = arith.constant 0 : i32
    %c0_i32_1 = arith.constant 0 : i32
    return %arg0, %c0_i32, %c0_i32_0 : i32, i32, i32
  }
  func.func @transform_6(%arg0: i32) -> (i32, i32, i32) {
    %c0_i32 = arith.constant 0 : i32
    %c0_i32_0 = arith.constant 0 : i32
    %c0_i32_1 = arith.constant 0 : i32
    return %arg0, %c0_i32, %c0_i32_0 : i32, i32, i32
  }
  func.func @transform_7(%arg0: i32) -> (i32, i32, i32) {
    %c0_i32 = arith.constant 0 : i32
    %c0_i32_0 = arith.constant 0 : i32
    %c0_i32_1 = arith.constant 0 : i32
    return %arg0, %c0_i32, %c0_i32_0 : i32, i32, i32
  }
  func.func @transform_8(%arg0: i32) -> (i32, i32, i32) {
    %c0_i32 = arith.constant 0 : i32
    %c0_i32_0 = arith.constant 0 : i32
    %c0_i32_1 = arith.constant 0 : i32
    return %arg0, %c0_i32, %c0_i32_0 : i32, i32, i32
  }
  func.func @transform_9(%arg0: i32) -> (i32, i32, i32) {
    %c0_i32 = arith.constant 0 : i32
    %c0_i32_0 = arith.constant 0 : i32
    %c0_i32_1 = arith.constant 0 : i32
    return %arg0, %c0_i32, %c0_i32_0 : i32, i32, i32
  }
  func.func @transform_10(%arg0: i32) -> (i32, i32, i32) {
    %c0_i32 = arith.constant 0 : i32
    %c0_i32_0 = arith.constant 0 : i32
    %c0_i32_1 = arith.constant 0 : i32
    return %arg0, %c0_i32, %c0_i32_0 : i32, i32, i32
  }
  func.func @transform_11(%arg0: i32) -> (i32, i32, i32) {
    %c0_i32 = arith.constant 0 : i32
    %c0_i32_0 = arith.constant 0 : i32
    %c0_i32_1 = arith.constant 0 : i32
    return %arg0, %c0_i32, %c0_i32_0 : i32, i32, i32
  }
  func.func @transform_12(%arg0: i32) -> (i32, i32, i32) {
    %c0_i32 = arith.constant 0 : i32
    %c0_i32_0 = arith.constant 0 : i32
    %c0_i32_1 = arith.constant 0 : i32
    return %arg0, %c0_i32, %c0_i32_0 : i32, i32, i32
  }
  func.func @transform_13(%arg0: i32) -> (i32, i32, i32) {
    %c0_i32 = arith.constant 0 : i32
    %c0_i32_0 = arith.constant 0 : i32
    %c0_i32_1 = arith.constant 0 : i32
    return %arg0, %c0_i32, %c0_i32_0 : i32, i32, i32
  }
  func.func @transform_14(%arg0: i32) -> (i32, i32, i32) {
    %c0_i32 = arith.constant 0 : i32
    %c0_i32_0 = arith.constant 0 : i32
    %c0_i32_1 = arith.constant 0 : i32
    return %arg0, %c0_i32, %c0_i32_0 : i32, i32, i32
  }
  func.func @transform_15(%arg0: i32) -> (i32, i32) {
    %c0_i32 = arith.constant 0 : i32
    %c0_i32_0 = arith.constant 0 : i32
    %c0_i32_1 = arith.constant 0 : i32
    return %c0_i32, %c0_i32_0 : i32, i32
  }
}

</mosaic_0001>

<bundles_post_ra>
// kernel: bert_forward.1
= control target key start
LH: loop header
LB: loop body
LE: loop exit
PB: predicated region body
PF: predicated region fallthrough
CT: control target
= control target key end

     0   :  { %s3568_s0 = inlined_call_operand.vmem [shape: f32[16,32], index: 0, kind: input, shape index: {}]   ;;  %s3569_s1 = inlined_call_operand.vmem [shape: f32[1,32], index: 1, kind: input, shape index: {}]   ;;  %s3570_s2 = inlined_call_operand.vmem [shape: f32[1,32], index: 2, kind: input, shape index: {}]   ;;  %s3571_s3 = inlined_call_operand.vmem [shape: f32[2,32,96], index: 3, kind: input, shape index: {}]   ;;  %s3572_s4 = inlined_call_operand.vmem [shape: f32[2,1,96], index: 4, kind: input, shape index: {}]   ;;  %s3573_s5 = inlined_call_operand.vmem [shape: f32[2,32,32], index: 5, kind: input, shape index: {}]   ;;  %s3574_s6 = inlined_call_operand.vmem [shape: f32[2,1,32], index: 6, kind: input, shape index: {}]   ;;  %s3575_s7 = inlined_call_operand.vmem [shape: f32[2,1,32], index: 7, kind: input, shape index: {}]   ;;  %s3576_s8 = inlined_call_operand.vmem [shape: f32[2,1,32], index: 8, kind: input, shape index: {}]   ;;  %s3577_s9 = inlined_call_operand.vmem [shape: f32[2,32,64], index: 9, kind: input, shape index: {}]   ;;  %s3578_s10 = inlined_call_operand.vmem [shape: f32[2,1,64], index: 10, kind: input, shape index: {}]   ;;  %s3579_s11 = inlined_call_operand.vmem [shape: f32[2,64,32], index: 11, kind: input, shape index: {}]   ;;  %s3580_s12 = inlined_call_operand.vmem [shape: f32[2,1,32], index: 12, kind: input, shape index: {}]   ;;  %s3581_s13 = inlined_call_operand.vmem [shape: f32[2,1,32], index: 13, kind: input, shape index: {}]   ;;  %s3582_s14 = inlined_call_operand.vmem [shape: f32[2,1,32], index: 14, kind: input, shape index: {}]   ;;  %s3583_s15 = inlined_call_operand.hbm [shape: f32[16,32], index: 15, kind: output, shape index: {}]  }
   0x1   :  { %3587 = sst [smem:[#allocation9_spill]] %s3569_s1 }
   0x2   :  { %3588 = sst [smem:[#allocation10_spill]] %s3570_s2 }
   0x3   :  { %3589 = sst [smem:[#allocation11_spill]] %s3571_s3 }
   0x4   :  { %3590 = sst [smem:[#allocation12_spill]] %s3573_s5 }
   0x5   :  { %3591 = sst [smem:[#allocation13_spill]] %s3583_s15 }
   0x6   :  { %20 = vsyncpa [#allocation5], 0  ;;  %s3221_s18 = smov 0  }
   0x7 LB: > { %3592 = sst [smem:[#allocation7_spill]] %s3121_s18  ;;  %s3227_s19 = sadd.s32 4294967295, %s3121_s18   ;;  %s3121_s18 = sphi %s3221_s18, %s26_s18  }
   0x8   : > { %p2713_p0 = scmp.ge.s32.totalorder %s3121_s18, 1  ;;  %p527_p1 = scmp.lt.s32.totalorder %s3121_s18, 3 }
   0xa   : > { %p528_p2 = pnand %p2713_p0, %p527_p1 }
   0xc   : > { %531 = sbr.rel (%p528_p2) target bundleno = 2940 (0xb7c), region = 80 }
  0x13   : > { %p609_p3 = scmp.lt.s32.totalorder %s3227_s19, 1  ;;  %s3593_s3 = sld [smem:[#allocation11_spill]] }
  0x14   : > { %s3594_s5 = sld [smem:[#allocation12_spill]]  ;;  %p2722_p4 = scmp.ne.s32.totalorder %s3227_s19, 0 }
  0x15   : > { %s3233_s20 = scalar_select %p609_p3, %s3227_s19, 1 }
  0x16   : > { %656 = sbr.rel (%p2722_p4) target bundleno = 341 (0x155), region = 84  ;;  %v657_v0 = vld [vmem:[%s3568_s0] sm:$0xff] (!%p2722_p4)  ;;  %vm661_vm0 = vcmask (!%p2722_p4), 261120   ;;  %v658_v1 = vld [vmem:[%s3568_s0 + $0x8] sm:$0xff] (!%p2722_p4)  ;;  %s3596_s2 = sld [smem:[#allocation9_spill]] (!%p2722_p4) }
  0x17   : > { %s2769_s21 = sshll.u32 %s3233_s20, 5  ;;  %s646_s22 = scalar_lea.vmem %s3580_s12, %s3233_s20  ;;  %v662_v2 = vsel (!%p2722_p4), %vm661_vm0, %v657_v0, 0.0  ;;  %v665_v3 = vsel (!%p2722_p4), %vm661_vm0, %v658_v1, 0.0 }
  0x18   : > { %s649_s25 = scalar_lea.vmem %s3581_s13, %s3233_s20  ;;  %s652_s1 = scalar_lea.vmem %s3582_s14, %s3233_s20  ;;  %663 = vadd.xlane.f32.xlu0 (!%p2722_p4), %v662_v2 }
  0x19   : > { %s3243_s27 = scalar_lea.vmem %s3593_s3, %s2769_s21  ;;  %s3265_s3 = scalar_lea.vmem %s3577_s9, %s2769_s21 }
  0x1a   : > { %s3248_s30 = scalar_lea.vmem %s3594_s5, %s2769_s21  ;;  %s638_s5 = scalar_lea.vmem %s3578_s10, %s3233_s20 }
  0x1b   : > { %3595 = sst [smem:[#allocation8_spill]] %s3248_s30  ;;  %s2772_s30 = sshll.u32 %s3233_s20, 6 }
  0x1c   : > { %s3275_s18 = scalar_lea.vmem %s3579_s11, %s2772_s30  ;;  %666 = vadd.xlane.f32.xlu0 (!%p2722_p4), %v665_v3  ;;  %v2723_v21 = vld [vmem:[%s3596_s2] ss:$0 sm:$0xff] (!%p2722_p4)  ;;  %s3597_s21 = sld [smem:[#allocation10_spill]] (!%p2722_p4) }
  0x22   : > { %v2724_v23 = vld [vmem:[%s3597_s21] ss:$0 sm:$0xff] }
  0xa5   : > { %v664_v4 = vpop.xlane.xlu0 %663 }
  0xa6   : > { %v669_v5 = vmul.f32 0.03125, %v664_v4 }
  0xa8   : > { %v671_v6 = vsub.f32 %v657_v0, %v669_v5 }
  0xa9   : > { %v667_v7 = vpop.xlane.xlu0 %666 }
  0xaa   : > { %v670_v8 = vmul.f32 0.03125, %v667_v7  ;;  %v673_v9 = vmul.f32 %v671_v6, %v671_v6 }
  0xac   : > { %v672_v10 = vsub.f32 %v658_v1, %v670_v8  ;;  %v675_v11 = vsel %vm661_vm0, %v673_v9, 0.0 }
  0xad   : > { %676 = vadd.xlane.f32.xlu1 %v675_v11 }
  0xae   : > { %v674_v12 = vmul.f32 %v672_v10, %v672_v10 }
  0xb0   : > { %v678_v13 = vsel %vm661_vm0, %v674_v12, 0.0 }
  0xb1   : > { %679 = vadd.xlane.f32.xlu1 %v678_v13 }
 0x13a   : > { %v677_v14 = vpop.xlane.xlu1 %676 }
 0x13b   : > { %v681_v15 = vmul.f32 0.03125, %v677_v14 }
 0x13d   : > { %v683_v16 = vadd.f32 1e-12, %v681_v15 }
 0x13e   : > { %v680_v17 = vpop.xlane.xlu1 %679 }
 0x13f   : > { %3037 = vrsqrt.f32 %v683_v16  ;;  %v682_v18 = vmul.f32 0.03125, %v680_v17 }
 0x141   : > { %v684_v19 = vadd.f32 1e-12, %v682_v18 }
 0x143   : > { %3039 = vrsqrt.f32 %v684_v19 }
 0x149   : > { %v3038_v20 = vpop.eup %3037 }
 0x14a   : > { %v687_v22 = vmul.f32 %v3038_v20, %v671_v6 }
 0x14c   : > { %v695_v24 = vmul.f32 %v2723_v21, %v687_v22 }
 0x14d   : > { %v3040_v25 = vpop.eup %3039 }
 0x14e   : > { %v703_v26 = vadd.f32 %v2724_v23, %v695_v24  ;;  %v688_v27 = vmul.f32 %v3040_v25, %v672_v10 }
 0x150   : > { %705 = vst.msk [vmem:[#allocation2] sm:$0xff] %vm661_vm0, %v703_v26  ;;  %v696_v28 = vmul.f32 %v2723_v21, %v688_v27 }
 0x152   : > { %v704_v29 = vadd.f32 %v2724_v23, %v696_v28 }
 0x154   : > { %706 = vst.msk [vmem:[#allocation2 + $0x8] sm:$0xff] %vm661_vm0, %v704_v29 }
 0x155 PF: > { %v709_v30 = vld [vmem:[%s3243_s27] sm:$0xff]  ;;  %v710_v31 = vld [vmem:[%s3243_s27 + $0x8] sm:$0xff]  ;;  %v711_v32 = vld [vmem:[%s3243_s27 + $0x10] sm:$0xff]  ;;  %vm720_vm1 = vcmask 261120   ;;  %v3123_v38 = vmov 0.0   ;;  %vm3124_vm2 = vmmov 0   ;;  %s3598_s28 = scalar_lea.vmem %s3572_s4, %s3233_s20 }
 0x156   : > { %v2965_v33 = vpack.c.bf16 %v710_v31, %v709_v30  ;;  %v712_v34 = vld [vmem:[%s3243_s27 + $0x18] sm:$0xff]  ;;  %2854 = vmatprep.subr.mxu0 %v3123_v38  ;;  %2856 = vmatprep.mubr.msk.f32.mxu0 %vm3124_vm2, %v3123_v38  ;;  %v2725_v39 = vld [vmem:[%s3598_s28] ss:$0 sm:$0xff]  ;;  %s3125_s29 = smov 120   ;;  %s3126_s30 = smov 96   ;;  %vm805_vm3 = vcmask 64512  }
 0x157   : > { %v3312_v35 = vld [vmem:[#allocation2] sm:$0xff]  ;;  %v2969_v36 = vpack.c.bf16 %v712_v34, %v711_v32  ;;  %s3127_s16 = smov 80   ;;  %s3128_s24 = smov 88   ;;  %vm1139_vm4 = vcmask 130112   ;;  %vm1311_vm5 = vcmask 195712   ;;  %vm1483_vm6 = vcmask 261312  }
 0x158   : > { %2841 = vmatprep.mubr.msk.f32.mxu1 %vm720_vm1, %v3312_v35  ;;  %2966 = vmatprep.subr.bf16.mxu1 %v2965_v33  ;;  %s3129_s17 = smov 72   ;;  %s3130_s2 = smov 112   ;;  %vm2422_vm7 = vcmask 523264  }
 0x159   : > { %2968 = vmatpush3.bf16.msra.mxu1 %v2965_v33  ;;  %s3131_s15 = smov 104   ;;  %s3132_s23 = smov 56  }
 0x15a   : > { %2970 = vmatprep.subr.bf16.mxu1 %v2969_v36  ;;  %s3133_s21 = smov 64   ;;  %s3134_s27 = smov 40  }
 0x15b   : > { %v3316_v37 = vld [vmem:[#allocation2 + $0x8] sm:$0xff]  ;;  %s3135_s26 = smov 48   ;;  %s3599_s28 = sld [smem:[#allocation8_spill]] }
 0x15c   : > { %p3009_p5 = scmp.eq.s32.totalorder %s3227_s19, 1 }
 0x15d   : > { %2972 = vmatpush3.bf16.msra.mxu1 %v2969_v36 }
 0x15e   : > { %2844 = vmatprep.subr.mxu1 %v3123_v38 }
 0x160   : > { %2842 = vmatmul.mubr.msk.f32.vlgmr.msra.gmra.mrb[0].mxu1 %vm720_vm1, %v3316_v37 }
 0x161   : > { %2846 = vmatprep.mubr.msk.f32.mxu1 %vm3124_vm2, %v3123_v38 }
 0x233   : > { %v2843_v40 = vpop.f32.mrb[0].mxu1 }
 0x234   : > { %v793_v41 = vpop.f32.mrb[1].mxu1  ;;  %v3339_v43 = vadd.f32 %v2843_v40, %v2725_v39 }
 0x235   : > { %v3331_v42 = vadd.f32 %v2725_v39, %v793_v41 }
 0x237   : > { %969 = vrot.lane.b32.xlu1 %v3331_v42, %s3125_s29  ;;  %803 = vrot.lane.b32.xlu0 %v3331_v42, %s3126_s30 }
 0x23b   : > { %1143 = vrot.lane.b32.xlu1 %v3331_v42, %s3127_s16  ;;  %971 = vrot.lane.b32.xlu0 %v3331_v42, %s3128_s24 }
 0x23f   : > { %1315 = vrot.lane.b32.xlu1 %v3331_v42, %s3129_s17  ;;  %1141 = vrot.lane.b32.xlu0 %v3331_v42, %s3130_s2 }
 0x243   : > { %1486 = vrot.lane.b32.xlu1 %v3339_v43, %s3126_s30  ;;  %1313 = vrot.lane.b32.xlu0 %v3331_v42, %s3131_s15  ;;  %s3137_s30 = smov 16  }
 0x247   : > { %1651 = vrot.lane.b32.xlu1 %v3339_v43, %s3125_s29  ;;  %1653 = vrot.lane.b32.xlu0 %v3339_v43, %s3128_s24  ;;  %s3136_s29 = smov 8  }
 0x24b   : > { %1822 = vrot.lane.b32.xlu1 %v3339_v43, %s3130_s2  ;;  %1824 = vrot.lane.b32.xlu0 %v3339_v43, %s3127_s16  ;;  %s3138_s16 = smov 24   ;;  %s3600_s2 = scalar_lea.vmem %s3574_s6, %s3233_s20 }
 0x24f   : > { %1993 = vrot.lane.b32.xlu1 %v3339_v43, %s3131_s15  ;;  %1995 = vrot.lane.b32.xlu0 %v3339_v43, %s3129_s17 }
 0x253   : > { %1059 = vrot.lane.b32.xlu1 %v3331_v42, %s3132_s23  ;;  %892 = vrot.lane.b32.xlu0 %v3331_v42, %s3133_s21 }
 0x2a9   : > { %v970_v44 = vpop.permute.xlu1 %969  ;;  %v804_v45 = vpop.permute.xlu0 %803 }
 0x2aa   : > { %2845 = vmatpush3.xpose.msk.msra.mxu1 %vm805_vm3, %v804_v45 }
 0x2ab   : > { %2849 = vmatprep.subr.mxu1 %v3123_v38 }
 0x2ad   : > { %v1144_v46 = vpop.permute.xlu1 %1143  ;;  %2847 = vmatmul.mubr.msk.f32.vlgmr.msra.gmra.mrb[2].mxu1 %vm805_vm3, %v3331_v42  ;;  %v972_v47 = vpop.permute.xlu0 %971 }
 0x2ae   : > { %2855 = vmatpush3.xpose.msk.msra.mxu0 %vm805_vm3, %v972_v47  ;;  %2851 = vmatprep.mubr.msk.f32.mxu1 %vm3124_vm2, %v3123_v38 }
 0x2af   : > { %2864 = vmatprep.subr.mxu0 %v3123_v38 }
 0x2b1   : > { %v1316_v48 = vpop.permute.xlu1 %1315  ;;  %2857 = vmatmul.mubr.msk.f32.vlgmr.msra.gmra.mrb[0].mxu0 %vm805_vm3, %v970_v44  ;;  %v1142_v49 = vpop.permute.xlu0 %1141 }
 0x2b2   : > { %2865 = vmatpush3.xpose.msk.msra.mxu0 %vm805_vm3, %v1144_v46  ;;  %2866 = vmatprep.mubr.msk.f32.mxu0 %vm3124_vm2, %v3123_v38 }
 0x2b3   : > { %2874 = vmatprep.subr.mxu0 %v3123_v38 }
 0x2b5   : > { %2867 = vmatmul.mubr.msk.f32.vlgmr.msra.gmra.mrb[2].mxu0 %vm805_vm3, %v1142_v49  ;;  %v1314_v50 = vpop.permute.xlu0 %1313  ;;  %v1487_v51 = vpop.permute.xlu1 %1486 }
 0x2b6   : > { %2875 = vmatpush3.xpose.msk.msra.mxu0 %vm805_vm3, %v1316_v48  ;;  %2876 = vmatprep.mubr.msk.f32.mxu0 %vm3124_vm2, %v3123_v38 }
 0x2b7   : > { %2884 = vmatprep.subr.mxu0 %v3123_v38 }
 0x2b9   : > { %2877 = vmatmul.mubr.msk.f32.vlgmr.msra.gmra.mrb[4].mxu0 %vm805_vm3, %v1314_v50  ;;  %v1654_v52 = vpop.permute.xlu0 %1653  ;;  %v1652_v53 = vpop.permute.xlu1 %1651 }
 0x2ba   : > { %2885 = vmatpush3.xpose.msk.msra.mxu0 %vm805_vm3, %v1487_v51  ;;  %2886 = vmatprep.mubr.msk.f32.mxu0 %vm3124_vm2, %v3123_v38 }
 0x2bb   : > { %2894 = vmatprep.subr.mxu0 %v3123_v38 }
 0x2bd   : > { %2887 = vmatmul.mubr.msk.f32.vlgmr.msra.gmra.mrb[6].mxu0 %vm805_vm3, %v3339_v43  ;;  %v1825_v54 = vpop.permute.xlu0 %1824  ;;  %v1823_v56 = vpop.permute.xlu1 %1822 }
 0x2be   : > { %2895 = vmatpush3.xpose.msk.msra.mxu0 %vm805_vm3, %v1654_v52  ;;  %2896 = vmatprep.mubr.msk.f32.mxu0 %vm3124_vm2, %v3123_v38 }
 0x2bf   : > { %2904 = vmatprep.subr.mxu0 %v3123_v38 }
 0x2c1   : > { %2897 = vmatmul.mubr.msk.f32.vlgmr.msra.gmra.mrb[8].mxu0 %vm805_vm3, %v1652_v53  ;;  %v1996_v55 = vpop.permute.xlu0 %1995  ;;  %v1994_v58 = vpop.permute.xlu1 %1993 }
 0x2c2   : > { %2905 = vmatpush3.xpose.msk.msra.mxu0 %vm805_vm3, %v1825_v54  ;;  %2906 = vmatprep.mubr.msk.f32.mxu0 %vm3124_vm2, %v3123_v38 }
 0x2c3   : > { %2914 = vmatprep.subr.mxu0 %v3123_v38 }
 0x2c5   : > { %2907 = vmatmul.mubr.msk.f32.vlgmr.msra.gmra.mrb[10].mxu0 %vm805_vm3, %v1823_v56  ;;  %v893_v57 = vpop.permute.xlu0 %892  ;;  %v3405_v27 = vpop.permute.xlu1 %1059 }
 0x2c6   : > { %2850 = vmatpush3.msra.mxu1 %v893_v57  ;;  %2915 = vmatpush3.xpose.msk.msra.mxu0 %vm805_vm3, %v1996_v55 }
 0x2c7   : > { %2916 = vmatprep.mubr.msk.f32.mxu0 %vm3124_vm2, %v3123_v38  ;;  %2859 = vmatprep.subr.mxu1 %v3123_v38 }
 0x2c9   : > { %2917 = vmatmul.mubr.msk.f32.vlgmr.msra.gmra.mrb[12].mxu0 %vm805_vm3, %v1994_v58 }
 0x380   : > { %v876_v59 = vpop.f32.mrb[2].mxu1 }
 0x381   : > { %v880_v60 = vmul.f32 0.35355338, %v876_v59  ;;  %v2848_v61 = vpop.f32.mrb[3].mxu1 }
 0x383   : > { %v881_v62 = vsel %vm805_vm3, %v880_v60, -inf }
 0x384   : > { %882 = vmax.xlane.f32.xlu0 %v881_v62  ;;  %v1043_v63 = vpop.f32.mrb[0].mxu0 }
 0x385   : > { %v1047_v0 = vmul.f32 0.35355338, %v1043_v63  ;;  %v2858_v1 = vpop.f32.mrb[1].mxu0 }
 0x387   : > { %v1048_v2 = vsel %vm805_vm3, %v1047_v0, -inf }
 0x388   : > { %1049 = vmax.xlane.f32.xlu1 %v1048_v2  ;;  %v1215_v3 = vpop.f32.mrb[2].mxu0 }
 0x389   : > { %v1219_v4 = vmul.f32 0.35355338, %v1215_v3  ;;  %v2868_v5 = vpop.f32.mrb[3].mxu0 }
 0x38b   : > { %v1220_v6 = vsel %vm805_vm3, %v1219_v4, -inf }
 0x38c   : > { %1221 = vmax.xlane.f32.xlu0 %v1220_v6  ;;  %v1387_v7 = vpop.f32.mrb[4].mxu0 }
 0x38d   : > { %v1391_v8 = vmul.f32 0.35355338, %v1387_v7  ;;  %v2878_v9 = vpop.f32.mrb[5].mxu0 }
 0x38f   : > { %v1392_v10 = vsel %vm805_vm3, %v1391_v8, -inf }
 0x390   : > { %1393 = vmax.xlane.f32.xlu0 %v1392_v10  ;;  %v1558_v11 = vpop.f32.mrb[6].mxu0 }
 0x391   : > { %v1562_v12 = vmul.f32 0.35355338, %v1558_v11  ;;  %v2888_v13 = vpop.f32.mrb[7].mxu0 }
 0x393   : > { %v1563_v14 = vsel %vm805_vm3, %v1562_v12, -inf }
 0x394   : > { %1564 = vmax.xlane.f32.xlu1 %v1563_v14  ;;  %v1725_v15 = vpop.f32.mrb[8].mxu0 }
 0x395   : > { %v1729_v16 = vmul.f32 0.35355338, %v1725_v15  ;;  %v2898_v17 = vpop.f32.mrb[9].mxu0 }
 0x397   : > { %v1730_v18 = vsel %vm805_vm3, %v1729_v16, -inf }
 0x398   : > { %1731 = vmax.xlane.f32.xlu0 %v1730_v18  ;;  %v1896_v19 = vpop.f32.mrb[10].mxu0 }
 0x399   : > { %v1900_v20 = vmul.f32 0.35355338, %v1896_v19  ;;  %v2908_v21 = vpop.f32.mrb[11].mxu0 }
 0x39b   : > { %v1901_v22 = vsel %vm805_vm3, %v1900_v20, -inf }
 0x39c   : > { %1902 = vmax.xlane.f32.xlu1 %v1901_v22  ;;  %v2067_v23 = vpop.f32.mrb[12].mxu0 }
 0x39d   : > { %v2071_v24 = vmul.f32 0.35355338, %v2067_v23  ;;  %v2918_v25 = vpop.f32.mrb[13].mxu0 }
 0x39f   : > { %v2072_v26 = vsel %vm805_vm3, %v2071_v24, -inf }
 0x3a0   : > { %2073 = vmax.xlane.f32.xlu0 %v2072_v26 }
 0x3ad   : > { %1403 = vrot.lane.b32.xlu1 %v3331_v42, %s3134_s27 }
 0x3b6   : > { %1231 = vrot.lane.b32.xlu0 %v3331_v42, %s3135_s26 }
 0x411   : > { %v883_v28 = vpop.xlane.xlu0 %882 }
 0x412   : > { %v884_v29 = vsub.f32 %v880_v60, %v883_v28 }
 0x414   : > { %v885_v30 = vmul.f32 1.442695, %v884_v29 }
 0x415   : > { %v1050_v31 = vpop.xlane.xlu1 %1049 }
 0x416   : > { %3041 = vpow2.f32 %v885_v30  ;;  %v1051_v32 = vsub.f32 %v1047_v0, %v1050_v31 }
 0x418   : > { %v1052_v33 = vmul.f32 1.442695, %v1051_v32 }
 0x419   : > { %v1222_v34 = vpop.xlane.xlu0 %1221 }
 0x41a   : > { %3043 = vpow2.f32 %v1052_v33  ;;  %v1223_v36 = vsub.f32 %v1219_v4, %v1222_v34 }
 0x41c   : > { %v1224_v39 = vmul.f32 1.442695, %v1223_v36 }
 0x41d   : > { %v1394_v40 = vpop.xlane.xlu0 %1393 }
 0x41e   : > { %3045 = vpow2.f32 %v1224_v39  ;;  %v1395_v41 = vsub.f32 %v1391_v8, %v1394_v40 }
 0x420   : > { %v3042_v44 = vpop.eup %3041  ;;  %v1396_v45 = vmul.f32 1.442695, %v1395_v41 }
 0x421   : > { %v887_v42 = vsel %vm805_vm3, %v3042_v44, 0.0  ;;  %v1565_v52 = vpop.xlane.xlu1 %1564 }
 0x422   : > { %3047 = vpow2.f32 %v1396_v45  ;;  %888 = vadd.xlane.f32.xlu1 %v887_v42  ;;  %v1566_v53 = vsub.f32 %v1562_v12, %v1565_v52 }
 0x424   : > { %v3044_v46 = vpop.eup %3043  ;;  %v1567_v57 = vmul.f32 1.442695, %v1566_v53  ;;  %v2168_v53 = vld [vmem:[%s3599_s28 + $0x10] sm:$0xff] }
 0x425   : > { %v1054_v47 = vsel %vm805_vm3, %v3044_v46, 0.0  ;;  %v1732_v54 = vpop.xlane.xlu0 %1731 }
 0x426   : > { %1055 = vadd.xlane.f32.xlu0 %v1054_v47  ;;  %v1733_v56 = vsub.f32 %v1729_v16, %v1732_v54  ;;  %3049 = vpow2.f32 %v1567_v57  ;;  %v2169_v54 = vld [vmem:[%s3599_s28 + $0x18] sm:$0xff] }
 0x428   : > { %v3046_v48 = vpop.eup %3045  ;;  %v1734_v60 = vmul.f32 1.442695, %v1733_v56 }
 0x429   : > { %v1226_v49 = vsel %vm805_vm3, %v3046_v48, 0.0  ;;  %v1903_v55 = vpop.xlane.xlu1 %1902 }
 0x42a   : > { %1227 = vadd.xlane.f32.xlu1 %v1226_v49  ;;  %v1904_v58 = vsub.f32 %v1900_v20, %v1903_v55  ;;  %3051 = vpow2.f32 %v1734_v60  ;;  %v2167_v49 = vld [vmem:[%s3599_s28 + $0x8] sm:$0xff]  ;;  %v2977_v55 = vpack.c.bf16 %v2169_v54, %v2168_v53  ;;  %v2411_v53 = vld [vmem:[%s3275_s18 + $0x20] sm:$0xff] }
 0x42b   : > { %v2412_v54 = vld [vmem:[%s3275_s18 + $0x28] sm:$0xff] }
 0x42c   : > { %v3410_v50 = vpop.eup %3047  ;;  %v1905_v61 = vmul.f32 1.442695, %v1904_v58 }
 0x42d   : > { %v1398_v51 = vsel %vm805_vm3, %v3410_v50, 0.0  ;;  %v2074_v59 = vpop.xlane.xlu0 %2073  ;;  %v1404_v8 = vpop.permute.xlu1 %1403 }
 0x42e   : > { %1399 = vadd.xlane.f32.xlu0 %v1398_v51  ;;  %v2075_v62 = vsub.f32 %v2071_v24, %v2074_v59  ;;  %3053 = vpow2.f32 %v1905_v61 }
 0x430   : > { %v2076_v63 = vmul.f32 1.442695, %v2075_v62  ;;  %v3050_v0 = vpop.eup %3049 }
 0x431   : > { %v1569_v2 = vsel %vm805_vm3, %v3050_v0, 0.0  ;;  %v1232_v9 = vpop.permute.xlu0 %1231 }
 0x432   : > { %3055 = vpow2.f32 %v2076_v63 }
 0x434   : > { %v3418_v1 = vpop.eup %3051 }
 0x435   : > { %v1736_v5 = vsel %vm805_vm3, %v3418_v1, 0.0 }
 0x438   : > { %v3421_v3 = vpop.eup %3053 }
 0x439   : > { %v1907_v4 = vsel %vm805_vm3, %v3421_v3, 0.0 }
 0x43b   : > { %1741 = vrot.lane.b32.xlu1 %v3339_v43, %s3132_s23 }
 0x43c   : > { %v3427_v6 = vpop.eup %3055 }
 0x43d   : > { %v2078_v7 = vsel %vm805_vm3, %v3427_v6, 0.0 }
 0x444   : > { %1574 = vrot.lane.b32.xlu0 %v3339_v43, %s3133_s21  ;;  %s3601_s21 = scalar_lea.vmem %s3575_s7, %s3233_s20 }
 0x45f   : > { %1570 = vadd.xlane.f32.xlu1 %v1569_v2 }
 0x463   : > { %1908 = vadd.xlane.f32.xlu1 %v1907_v4  ;;  %1737 = vadd.xlane.f32.xlu0 %v1736_v5 }
 0x467   : > { %2079 = vadd.xlane.f32.xlu1 %v2078_v7 }
 0x478   : > { %2083 = vrot.lane.b32.xlu1 %v3339_v43, %s3134_s27 }
 0x479   : > { %1912 = vrot.lane.b32.xlu0 %v3339_v43, %s3135_s26  ;;  %s3602_s26 = scalar_lea.vmem %s3576_s8, %s3233_s20 }
 0x4af   : > { %v889_v10 = vpop.xlane.xlu1 %888 }
 0x4b0   : > { %3057 = vrcp.f32 %v889_v10 }
 0x4b3   : > { %v1056_v11 = vpop.xlane.xlu0 %1055 }
 0x4b4   : > { %3059 = vrcp.f32 %v1056_v11 }
 0x4b7   : > { %v1228_v12 = vpop.xlane.xlu1 %1227 }
 0x4b8   : > { %3061 = vrcp.f32 %v1228_v12 }
 0x4ba   : > { %v3058_v13 = vpop.eup %3057 }
 0x4bb   : > { %v891_v14 = vmul.f32 %v3058_v13, %v3042_v44  ;;  %v1400_v15 = vpop.xlane.xlu0 %1399  ;;  %v1742_v22 = vpop.permute.xlu1 %1741 }
 0x4bc   : > { %3063 = vrcp.f32 %v1400_v15 }
 0x4bd   : > { %2852 = vmatmul.mubr.msk.f32.vlgmr.msra.gmra.mrb[4].mxu1 %vm805_vm3, %v891_v14 }
 0x4be   : > { %v3060_v16 = vpop.eup %3059  ;;  %2860 = vmatpush3.msra.mxu1 %v3405_v27  ;;  %2861 = vmatprep.mubr.msk.f32.mxu1 %vm3124_vm2, %v3123_v38 }
 0x4bf   : > { %v1058_v43 = vmul.f32 %v3060_v16, %v3044_v46  ;;  %2869 = vmatprep.subr.mxu1 %v3123_v38  ;;  %v1575_v21 = vpop.permute.xlu0 %1574 }
 0x4c1   : > { %2862 = vmatmul.mubr.msk.f32.vlgmr.msra.gmra.mrb[6].mxu1 %vm805_vm3, %v1058_v43 }
 0x4c2   : > { %v3062_v17 = vpop.eup %3061  ;;  %2870 = vmatpush3.msra.mxu1 %v1232_v9  ;;  %2871 = vmatprep.mubr.msk.f32.mxu1 %vm3124_vm2, %v3123_v38 }
 0x4c3   : > { %v1230_v18 = vmul.f32 %v3062_v17, %v3046_v48  ;;  %2879 = vmatprep.subr.mxu1 %v3123_v38  ;;  %v2166_v48 = vld [vmem:[%s3599_s28] sm:$0xff] }
 0x4c4   : > { %v2973_v51 = vpack.c.bf16 %v2167_v49, %v2166_v48  ;;  %v2408_v48 = vld [vmem:[%s3275_s18 + $0x8] sm:$0xff] }
 0x4c5   : > { %2872 = vmatmul.mubr.msk.f32.vlgmr.msra.gmra.mrb[8].mxu1 %vm805_vm3, %v1230_v18 }
 0x4c6   : > { %v3064_v19 = vpop.eup %3063  ;;  %2880 = vmatpush3.msra.mxu1 %v1404_v8  ;;  %2881 = vmatprep.mubr.msk.f32.mxu1 %vm3124_vm2, %v3123_v38 }
 0x4c7   : > { %v1402_v20 = vmul.f32 %v3064_v19, %v3410_v50  ;;  %2889 = vmatprep.subr.mxu1 %v3123_v38  ;;  %2974 = vmatprep.subr.bf16.mxu0 %v2973_v51 }
 0x4c8   : > { %2976 = vmatpush3.bf16.msra.mxu0 %v2973_v51  ;;  %v2410_v51 = vld [vmem:[%s3275_s18 + $0x18] sm:$0xff] }
 0x4c9   : > { %2882 = vmatmul.mubr.msk.f32.vlgmr.msra.gmra.mrb[10].mxu1 %vm805_vm3, %v1402_v20  ;;  %2978 = vmatprep.subr.bf16.mxu0 %v2977_v55 }
 0x4ca   : > { %2890 = vmatpush3.msra.mxu1 %v1575_v21  ;;  %2891 = vmatprep.mubr.msk.f32.mxu1 %vm3124_vm2, %v3123_v38 }
 0x4cb   : > { %2899 = vmatprep.subr.mxu1 %v3123_v38 }
 0x4cc   : > { %2980 = vmatpush3.bf16.msra.mxu0 %v2977_v55  ;;  %v2997_v55 = vpack.c.bf16 %v2412_v54, %v2411_v53 }
 0x4ec   : > { %v1571_v23 = vpop.xlane.xlu1 %1570 }
 0x4ed   : > { %3065 = vrcp.f32 %v1571_v23  ;;  %v2306_v23 = vld [vmem:[%s3265_s3 + $0x8] sm:$0xff] }
 0x4f0   : > { %v1909_v24 = vpop.xlane.xlu1 %1908  ;;  %v1738_v25 = vpop.xlane.xlu0 %1737 }
 0x4f1   : > { %3067 = vrcp.f32 %v1738_v25  ;;  %v2307_v25 = vld [vmem:[%s3265_s3 + $0x10] sm:$0xff] }
 0x4f2   : > { %3069 = vrcp.f32 %v1909_v24 }
 0x4f4   : > { %v2080_v26 = vpop.xlane.xlu1 %2079  ;;  %v1913_v32 = vpop.permute.xlu0 %1912 }
 0x4f5   : > { %3071 = vrcp.f32 %v2080_v26  ;;  %v2308_v26 = vld [vmem:[%s3265_s3 + $0x18] sm:$0xff] }
 0x4f7   : > { %v3066_v27 = vpop.eup %3065 }
 0x4f8   : > { %v1573_v28 = vmul.f32 %v3066_v27, %v3050_v0  ;;  %v2084_v36 = vpop.permute.xlu1 %2083  ;;  %v2985_v27 = vpack.c.bf16 %v2308_v26, %v2307_v25 }
 0x4fa   : > { %2892 = vmatmul.mubr.msk.f32.vlgmr.msra.gmra.mrb[12].mxu1 %vm805_vm3, %v1573_v28 }
 0x4fb   : > { %2900 = vmatpush3.msra.mxu1 %v1742_v22  ;;  %2901 = vmatprep.mubr.msk.f32.mxu1 %vm3124_vm2, %v3123_v38  ;;  %v3068_v29 = vpop.eup %3067  ;;  %v2305_v22 = vld [vmem:[%s3265_s3] sm:$0xff] }
 0x4fc   : > { %2909 = vmatprep.subr.mxu1 %v3123_v38  ;;  %v1740_v30 = vmul.f32 %v3068_v29, %v3418_v1  ;;  %v3070_v31 = vpop.eup %3069  ;;  %v2981_v24 = vpack.c.bf16 %v2306_v23, %v2305_v22 }
 0x4fd   : > { %v1911_v33 = vmul.f32 %v3070_v31, %v3421_v3 }
 0x4fe   : > { %2902 = vmatmul.mubr.msk.f32.vlgmr.msra.gmra.mrb[14].mxu1 %vm805_vm3, %v1740_v30 }
 0x4ff   : > { %2910 = vmatpush3.msra.mxu1 %v1913_v32  ;;  %2911 = vmatprep.mubr.msk.f32.mxu1 %vm3124_vm2, %v3123_v38  ;;  %v3072_v34 = vpop.eup %3071 }
 0x500   : > { %2919 = vmatprep.subr.mxu1 %v3123_v38  ;;  %v2082_v39 = vmul.f32 %v3072_v34, %v3427_v6  ;;  %v2752_v6 = vld [vmem:[%s3600_s2] ss:$0 sm:$0xff]  ;;  %s3139_s2 = smov [#allocation4]  }
 0x501   : > { %s2560_s15 = sshll.u32 %s3139_s2, 4  ;;  %s2561_s15 = int_to_ptr.vmem [resolvable:$true] %s2560_s15 }
 0x502   : > { %2912 = vmatmul.mubr.msk.f32.vlgmr.msra.gmra.mrb[16].mxu1 %vm805_vm3, %v1911_v33  ;;  %p3092_p9 = scmp.lt.s32.totalorder %s2561_s15, %s2561_s15 }
 0x503   : > { %2920 = vmatpush3.msra.mxu1 %v2084_v36  ;;  %2921 = vmatprep.mubr.msk.f32.mxu1 %vm3124_vm2, %v3123_v38  ;;  %v2755_v36 = vld [vmem:[%s3601_s21] ss:$0 sm:$0xff] }
 0x504   : > { %2982 = vmatprep.subr.bf16.mxu1 %v2981_v24 }
 0x506   : > { %2922 = vmatmul.mubr.msk.f32.vlgmr.msra.gmra.mrb[18].mxu1 %vm805_vm3, %v2082_v39 }
 0x507   : > { %2984 = vmatpush3.bf16.msra.mxu1 %v2981_v24 }
 0x508   : > { %2986 = vmatprep.subr.bf16.mxu1 %v2985_v27 }
 0x50b   : > { %2988 = vmatpush3.bf16.msra.mxu1 %v2985_v27 }
 0x590   : > { %v964_v40 = vpop.f32.mrb[4].mxu1 }
 0x591   : > { %968 = vst.msk [vmem:[#allocation3] sm:$0xff] %vm805_vm3, %v964_v40  ;;  %v2853_v41 = vpop.f32.mrb[5].mxu1  ;;  %v2756_v40 = vld [vmem:[%s3602_s26] ss:$0 sm:$0xff] }
 0x594   : > { %v1131_v44 = vpop.f32.mrb[6].mxu1 }
 0x595   : > { %1136 = vrot.lane.b32.xlu0 %v1131_v44, %s3136_s29  ;;  %v2863_v45 = vpop.f32.mrb[7].mxu1 }
 0x598   : > { %v1303_v42 = vpop.f32.mrb[8].mxu1 }
 0x599   : > { %1308 = vrot.lane.b32.xlu1 %v1303_v42, %s3137_s30  ;;  %v2873_v38 = vpop.f32.mrb[9].mxu1 }
 0x59c   : > { %v1475_v46 = vpop.f32.mrb[10].mxu1 }
 0x59d   : > { %1480 = vrot.lane.b32.xlu1 %v1475_v46, %s3138_s16  ;;  %v2883_v47 = vpop.f32.mrb[11].mxu1 }
 0x59e   : > { %v2407_v47 = vld [vmem:[%s3275_s18] sm:$0xff] }
 0x59f   : > { %v2989_v49 = vpack.c.bf16 %v2408_v48, %v2407_v47 }
 0x5a1   : > { %2990 = vmatprep.subr.bf16.mxu0 %v2989_v49 }
 0x5cd   : > { %v1646_v50 = vpop.f32.mrb[12].mxu1 }
 0x5ce   : > { %1650 = vst.msk [vmem:[#allocation3 + $0x8] sm:$0xff] %vm805_vm3, %v1646_v50  ;;  %v2893_v52 = vpop.f32.mrb[13].mxu1  ;;  %v2409_v50 = vld [vmem:[%s3275_s18 + $0x10] sm:$0xff] }
 0x5cf   : > { %v2993_v52 = vpack.c.bf16 %v2410_v51, %v2409_v50 }
 0x5d1   : > { %v1813_v56 = vpop.f32.mrb[14].mxu1 }
 0x5d2   : > { %1818 = vrot.lane.b32.xlu0 %v1813_v56, %s3136_s29  ;;  %v2903_v57 = vpop.f32.mrb[15].mxu1  ;;  %v2413_v56 = vld [vmem:[%s3275_s18 + $0x30] sm:$0xff] }
 0x5d3   : > { %v2414_v57 = vld [vmem:[%s3275_s18 + $0x38] sm:$0xff] }
 0x5d5   : > { %v1984_v58 = vpop.f32.mrb[16].mxu1 }
 0x5d6   : > { %1989 = vrot.lane.b32.xlu0 %v1984_v58, %s3137_s30  ;;  %v2913_v59 = vpop.f32.mrb[17].mxu1  ;;  %v3001_v58 = vpack.c.bf16 %v2414_v57, %v2413_v56 }
 0x5d7   : > { %v2757_v59 = vld [vmem:[%s638_s5] ss:$0 sm:$0xff] }
 0x5d9   : > { %v2155_v60 = vpop.f32.mrb[18].mxu1 }
 0x5da   : > { %2160 = vrot.lane.b32.xlu1 %v2155_v60, %s3138_s16  ;;  %v2923_v61 = vpop.f32.mrb[19].mxu1 }
 0x607   : > { %v1137_v62 = vpop.permute.xlu0 %1136 }
 0x608   : > { %1140 = vst.msk [vmem:[#allocation3] sm:$0xff] %vm1139_vm4, %v1137_v62 }
 0x60b   : > { %v1309_v63 = vpop.permute.xlu1 %1308 }
 0x60c   : > { %1312 = vst.msk [vmem:[#allocation3] sm:$0xff] %vm1311_vm5, %v1309_v63 }
 0x60f   : > { %v1481_v0 = vpop.permute.xlu1 %1480 }
 0x610   : > { %1484 = vst.msk [vmem:[#allocation3] sm:$0xff] %vm1483_vm6, %v1481_v0 }
 0x617   : > { %v2164_v1 = vld [vmem:[#allocation3] sm:$0xff] }
 0x618   : > { %2932 = vmatprep.mubr.msk.f32.mxu0 %vm720_vm1, %v2164_v1 }
 0x644   : > { %v1819_v2 = vpop.permute.xlu0 %1818 }
 0x645   : > { %1821 = vst.msk [vmem:[#allocation3 + $0x8] sm:$0xff] %vm1139_vm4, %v1819_v2 }
 0x648   : > { %v1990_v3 = vpop.permute.xlu0 %1989 }
 0x649   : > { %1992 = vst.msk [vmem:[#allocation3 + $0x8] sm:$0xff] %vm1311_vm5, %v1990_v3 }
 0x64c   : > { %v2161_v4 = vpop.permute.xlu1 %2160 }
 0x64d   : > { %2163 = vst.msk [vmem:[#allocation3 + $0x8] sm:$0xff] %vm1483_vm6, %v2161_v4 }
 0x654   : > { %v2165_v5 = vld [vmem:[#allocation3 + $0x8] sm:$0xff] }
 0x655   : > { %2933 = vmatmul.mubr.msk.f32.vlgmr.msra.gmra.mrb[14].mxu0 %vm720_vm1, %v2165_v5 }
 0x656   : > { %2992 = vmatpush3.bf16.msra.mxu0 %v2989_v49 }
 0x657   : > { %2994 = vmatprep.subr.bf16.mxu0 %v2993_v52 }
 0x65a   : > { %2996 = vmatpush3.bf16.msra.mxu0 %v2993_v52 }
 0x65b   : > { %2998 = vmatprep.subr.bf16.mxu0 %v2997_v55 }
 0x65e   : > { %3000 = vmatpush3.bf16.msra.mxu0 %v2997_v55 }
 0x65f   : > { %3002 = vmatprep.subr.bf16.mxu0 %v3001_v58 }
 0x662   : > { %3004 = vmatpush3.bf16.msra.mxu0 %v3001_v58 }
 0x728   : > { %v2934_v7 = vpop.f32.mrb[14].mxu0 }
 0x729   : > { %v2255_v8 = vadd.f32 %v2934_v7, %v2752_v6  ;;  %v2249_v9 = vpop.f32.mrb[15].mxu0 }
 0x72a   : > { %v2250_v10 = vadd.f32 %v2752_v6, %v2249_v9 }
 0x72b   : > { %v2259_v11 = vadd.f32 %v2255_v8, %v3316_v37 }
 0x72c   : > { %v2258_v12 = vadd.f32 %v2250_v10, %v3312_v35  ;;  %v2760_v10 = vld [vmem:[%s646_s22] ss:$0 sm:$0xff] }
 0x72d   : > { %v2265_v13 = vsel %vm720_vm1, %v2259_v11, 0.0 }
 0x72e   : > { %2266 = vadd.xlane.f32.xlu1 %v2265_v13  ;;  %v2262_v14 = vsel %vm720_vm1, %v2258_v12, 0.0 }
 0x72f   : > { %2263 = vadd.xlane.f32.xlu0 %v2262_v14 }
 0x7bb   : > { %v2267_v15 = vpop.xlane.xlu1 %2266 }
 0x7bc   : > { %v2270_v16 = vmul.f32 0.03125, %v2267_v15  ;;  %v2264_v43 = vpop.xlane.xlu0 %2263 }
 0x7bd   : > { %v2269_v17 = vmul.f32 0.03125, %v2264_v43 }
 0x7be   : > { %v2272_v18 = vsub.f32 %v2259_v11, %v2270_v16 }
 0x7bf   : > { %v2271_v19 = vsub.f32 %v2258_v12, %v2269_v17 }
 0x7c0   : > { %v2274_v35 = vmul.f32 %v2272_v18, %v2272_v18 }
 0x7c1   : > { %v2273_v20 = vmul.f32 %v2271_v19, %v2271_v19 }
 0x7c2   : > { %v2278_v21 = vsel %vm720_vm1, %v2274_v35, 0.0 }
 0x7c3   : > { %v2275_v37 = vsel %vm720_vm1, %v2273_v20, 0.0 }
 0x7c4   : > { %2276 = vadd.xlane.f32.xlu0 %v2275_v37 }
 0x7c8   : > { %2279 = vadd.xlane.f32.xlu0 %v2278_v21 }
 0x851   : > { %v2277_v28 = vpop.xlane.xlu0 %2276 }
 0x852   : > { %v2281_v29 = vmul.f32 0.03125, %v2277_v28 }
 0x854   : > { %v2283_v30 = vadd.f32 1e-12, %v2281_v29 }
 0x855   : > { %v2280_v31 = vpop.xlane.xlu0 %2279 }
 0x856   : > { %3073 = vrsqrt.f32 %v2283_v30  ;;  %v2282_v32 = vmul.f32 0.03125, %v2280_v31 }
 0x858   : > { %v2284_v33 = vadd.f32 1e-12, %v2282_v32 }
 0x85a   : > { %3075 = vrsqrt.f32 %v2284_v33  ;;  %v2763_v33 = vld [vmem:[%s649_s25] ss:$0 sm:$0xff]  ;;  %s3085_s25 = scalar_lea.vmem %s2561_s15, 256 }
 0x85b   : > { %p3086_p6 = scmp.ne.s32.totalorder %s2561_s15, %s3085_s25  ;;  %p3093_p10 = scmp.lt.s32.totalorder %s3085_s25, %s3085_s25 }
 0x85d   : > { %p3087_p7 = pnand %p3086_p6, %p3009_p5  ;;  %p3094_p11 = por %p3093_p10, %p3092_p9 }
 0x85f   : > { %p3088_p8 = pneg %p3087_p7 }
 0x860   : > { %v3074_v34 = vpop.eup %3073 }
 0x861   : > { %v2287_v39 = vmul.f32 %v3074_v34, %v2271_v19  ;;  %p3095_p12 = pnand %p3094_p11, %p3088_p8 }
 0x863   : > { %v2295_v41 = vmul.f32 %v2755_v36, %v2287_v39 }
 0x864   : > { %v3076_v44 = vpop.eup %3075 }
 0x865   : > { %v2288_v45 = vmul.f32 %v3076_v44, %v2272_v18  ;;  %v2303_v42 = vadd.f32 %v2756_v40, %v2295_v41 }
 0x867   : > { %v2296_v38 = vmul.f32 %v2755_v36, %v2288_v45  ;;  %2943 = vmatprep.mubr.msk.f32.mxu1 %vm720_vm1, %v2303_v42 }
 0x869   : > { %v2304_v46 = vadd.f32 %v2756_v40, %v2296_v38  ;;  %v2764_v40 = vld [vmem:[%s652_s1] ss:$0 sm:$0xff] }
 0x86b   : > { %2944 = vmatmul.mubr.msk.f32.vlgmr.msra.gmra.mrb[20].mxu1 %vm720_vm1, %v2304_v46 }
 0x93e   : > { %v2945_v60 = vpop.f32.mrb[20].mxu1 }
 0x93f   : > { %v2394_v61 = vadd.f32 %v2945_v60, %v2757_v59  ;;  %v2388_v62 = vpop.f32.mrb[21].mxu1 }
 0x940   : > { %v2389_v63 = vadd.f32 %v2757_v59, %v2388_v62 }
 0x941   : > { %v2400_v0 = vmul.f32 0.70710677, %v2394_v61  ;;  %v2398_v7 = vmul.f32 0.5, %v2394_v61 }
 0x942   : > { %v2399_v1 = vmul.f32 0.70710677, %v2389_v63  ;;  %v2397_v5 = vmul.f32 0.5, %v2389_v63 }
 0x943   : > { %3077 = verf.f32 %v2400_v0 }
 0x944   : > { %3079 = verf.f32 %v2399_v1 }
 0x94d   : > { %v3078_v2 = vpop.eup %3077 }
 0x94e   : > { %v3080_v3 = vpop.eup %3079  ;;  %v2404_v4 = vadd.f32 1.0, %v3078_v2 }
 0x94f   : > { %v2403_v6 = vadd.f32 1.0, %v3080_v3 }
 0x950   : > { %v2406_v9 = vmul.f32 %v2404_v4, %v2398_v7 }
 0x951   : > { %v2405_v8 = vmul.f32 %v2403_v6, %v2397_v5 }
 0x953   : > { %2962 = vmatprep.mubr.msk.f32.mxu0 %vm2422_vm7, %v2405_v8 }
 0x954   : > { %2963 = vmatmul.mubr.msk.f32.vlgmr.msra.gmra.mrb[16].mxu0 %vm2422_vm7, %v2406_v9 }
 0xa27   : > { %v2964_v11 = vpop.f32.mrb[16].mxu0 }
 0xa28   : > { %v2501_v12 = vadd.f32 %v2964_v11, %v2760_v10  ;;  %v2495_v13 = vpop.f32.mrb[17].mxu0 }
 0xa29   : > { %v2496_v14 = vadd.f32 %v2760_v10, %v2495_v13 }
 0xa2a   : > { %v2505_v15 = vadd.f32 %v2501_v12, %v2304_v46 }
 0xa2b   : > { %v2504_v16 = vadd.f32 %v2496_v14, %v2303_v42 }
 0xa2c   : > { %v2511_v43 = vsel %vm720_vm1, %v2505_v15, 0.0 }
 0xa2d   : > { %2512 = vadd.xlane.f32.xlu0 %v2511_v43  ;;  %v2508_v17 = vsel %vm720_vm1, %v2504_v16, 0.0 }
 0xa2e   : > { %2509 = vadd.xlane.f32.xlu1 %v2508_v17 }
 0xaba   : > { %v2513_v18 = vpop.xlane.xlu0 %2512 }
 0xabb   : > { %v2515_v19 = vmul.f32 0.03125, %v2513_v18  ;;  %v2510_v20 = vpop.xlane.xlu1 %2509 }
 0xabc   : > { %v2514_v37 = vmul.f32 0.03125, %v2510_v20 }
 0xabd   : > { %v2517_v35 = vsub.f32 %v2505_v15, %v2515_v19 }
 0xabe   : > { %v2516_v21 = vsub.f32 %v2504_v16, %v2514_v37 }
 0xabf   : > { %v2519_v22 = vmul.f32 %v2517_v35, %v2517_v35 }
 0xac0   : > { %v2518_v23 = vmul.f32 %v2516_v21, %v2516_v21 }
 0xac1   : > { %v2523_v24 = vsel %vm720_vm1, %v2519_v22, 0.0 }
 0xac2   : > { %2524 = vadd.xlane.f32.xlu0 %v2523_v24  ;;  %v2520_v25 = vsel %vm720_vm1, %v2518_v23, 0.0 }
 0xac3   : > { %2521 = vadd.xlane.f32.xlu1 %v2520_v25 }
 0xb4f   : > { %v2525_v26 = vpop.xlane.xlu0 %2524 }
 0xb50   : > { %v2527_v27 = vmul.f32 0.03125, %v2525_v26  ;;  %v2522_v28 = vpop.xlane.xlu1 %2521 }
 0xb51   : > { %v2526_v29 = vmul.f32 0.03125, %v2522_v28 }
 0xb52   : > { %v2529_v30 = vadd.f32 1e-12, %v2527_v27 }
 0xb53   : > { %v2528_v31 = vadd.f32 1e-12, %v2526_v29 }
 0xb54   : > { %3081 = vrsqrt.f32 %v2529_v30 }
 0xb55   : > { %3083 = vrsqrt.f32 %v2528_v31 }
 0xb5e   : > { %v3082_v32 = vpop.eup %3081 }
 0xb5f   : > { %v3084_v34 = vpop.eup %3083  ;;  %v2533_v36 = vmul.f32 %v3082_v32, %v2517_v35 }
 0xb60   : > { %v2532_v39 = vmul.f32 %v3084_v34, %v2516_v21 }
 0xb61   : > { %v2541_v41 = vmul.f32 %v2763_v33, %v2533_v36 }
 0xb62   : > { %v2540_v44 = vmul.f32 %v2763_v33, %v2532_v39 }
 0xb63   : > { %v2549_v45 = vadd.f32 %v2764_v40, %v2541_v41 }
 0xb64   : > { %v2548_v42 = vadd.f32 %v2764_v40, %v2540_v44 }
 0xb65   : > { %2551 = vst.msk [vmem:[#allocation2 + $0x8] sm:$0xff] %vm720_vm1, %v2549_v45  ;;  %2553 = vst.msk [vmem:[#allocation4 + $0x8] sm:$0xff] %vm720_vm1, %v2549_v45 }
 0xb66   : > { %2550 = vst.msk [vmem:[#allocation2] sm:$0xff] %vm720_vm1, %v2548_v42  ;;  %2552 = vst.msk [vmem:[#allocation4] sm:$0xff] %vm720_vm1, %v2548_v42 }
 0xb67   : > { %3098 = shalt.err (!%p3095_p12)
}
 0xb68   : > { %s3603_s23 = sld [smem:[#allocation13_spill]] }
 0xb6e   : > { %s3099_s21 = scalar_lea.hbm %s3603_s23, 256 }
 0xb6f   : > { %p3100_p13 = scmp.ne.s32.totalorder %s3603_s23, %s3099_s21  ;;  %p3105_p2 = scmp.lt.u32.totalorder %s3099_s21, %s3603_s23 }
 0xb71   : > { %p3101_p0 = pnand %p3100_p13, %p3009_p5 }
 0xb73   : > { %p3102_p1 = pneg %p3101_p0 }
 0xb75   : > { %p3107_p3 = pnand %p3105_p2, %p3102_p1 }
 0xb77   : > { %3110 = shalt.err (!%p3107_p3)
}
 0xb78   : > { %s3140_s30 = smov 128  }
 0xb79   : > { %3006 = dma.vmem_to_hbm [thread:$0]  (%p3009_p5), %s2561_s15, 256, %s3603_s23, [#allocation5], %s3140_s30, %s3140_s30, %s3136_s29  }
 0xb7a   : > { %3116 = dma.done.wait (%p3009_p5), [#allocation5], 256  }
 0xb7b   : > { %3118 = vsyncadd (%p3009_p5), [#allocation5], 4294967040 }
 0xb7c PF: > { %s3604_s22 = sld [smem:[#allocation7_spill]] }
 0xb82   : > { %s26_s18 = sadd.s32 1, %s3604_s22  }
 0xb83   : > { %p23_p4 = scmp.ge.s32.totalorder %s26_s18, 4  }
 0xb85   :  { %25 = sbr.rel (!%p23_p4) target bundleno = 7 (0x7), region = 144 }
 0xb8c   :  { %2576 = vsyncpa [#allocation5], 1 }
 0xb8d   :  { %2578 = vsyncpa [#allocation5 + $0x1], 1 }

</bundles_post_ra>
